<compile_context>
chip_gen: v7x
topology: tpu7x:2x2x1
jax: 0.10.0
libtpu: 0.0.40
codegen_flags: <defaults>
</compile_context>

<pallas_src>
import functools

import jax
import jax.numpy as jnp
from jax.experimental import pallas as pl
from jax.experimental.pallas import tpu as pltpu


def encoder_kernel(ids_ref, emb_ref, *refs, seq_len, batch, bp, hid_dim, n_layers, vocab):
    """Fused embedding-gather + multi-layer LSTM forward (wavefront schedule).

    ids_ref : (seq_len*bp, 1) int32  -- batch-padded token ids
    emb_ref : (vocab, emb_dim) bf16  -- embedding table
    refs    : [w_ih0, w_hh0, b0] + [w_cat_l, b_l]*(n_layers-1) + [hidden_ref, cell_ref]
              w_* are bf16, biases f32; w_cat_l = concat([w_ih_l; w_hh_l], axis=0).
    hidden_ref / cell_ref : (n_layers*bp, hid_dim) f32 outputs (padded batch).
    """
    H = hid_dim
    S = seq_len
    n_w = 3 + 2 * (n_layers - 1)
    w_refs = refs[:n_w]
    hidden_ref = refs[n_w]
    cell_ref = refs[n_w + 1]

    # ---- Embedding gather fused in-kernel as a one-hot MXU matmul (exact for 0/1 weights) ---
    ids = ids_ref[...]                                                  # (S*BP, 1) int32
    iota = jax.lax.broadcasted_iota(jnp.int32, (S * bp, vocab), 1)
    onehot = (iota == ids).astype(jnp.bfloat16)
    x2d = jnp.dot(onehot, emb_ref[...], preferred_element_type=jnp.float32)   # (S*BP, E)
    # nn.Dropout is identity in eval mode.
    # TODO(synk): training-mode dropout (input + inter-layer) would need pltpu.prng_* here.

    # ---- Layer 0: hoisted input projection, ONE GEMM over the whole sequence ----------------
    w_ih0 = w_refs[0][...]                                              # (E, 4H) bf16
    b0 = w_refs[2][...]                                                 # (1, 4H) f32
    gx0 = jnp.dot(x2d.astype(jnp.bfloat16), w_ih0,
                  preferred_element_type=jnp.float32) + b0              # (S*BP, 4H)

    # Recurrent weights: layer 0 -> W_hh alone; layers >= 1 -> fused [W_ih; W_hh] so every
    # wavefront cell is a single MXU push.
    # TODO(synk): could hold W_hh in MXU staging regs (pltpu.matmul_push_rhs/acc_lhs/pop);
    #             kept jnp.dot for portability across v5e/v6e/v7x.
    w_rec = [w_refs[1][...]]                                            # (H, 4H) bf16
    bias = [b0]
    for l in range(1, n_layers):
        w_rec.append(w_refs[3 + 2 * (l - 1)][...])                      # (2H, 4H) bf16
        bias.append(w_refs[3 + 2 * (l - 1) + 1][...])                   # (1, 4H) f32

    h = [jnp.zeros((bp, H), jnp.float32) for _ in range(n_layers)]
    c = [jnp.zeros((bp, H), jnp.float32) for _ in range(n_layers)]

    def lstm_cell(gates, c_prev):
        sig = jax.nn.sigmoid(gates)                                     # one 128-lane EUP pass
        i = sig[:, 0 * H:1 * H]
        f = sig[:, 1 * H:2 * H]
        o = sig[:, 3 * H:4 * H]
        g = jnp.tanh(gates[:, 2 * H:3 * H])
        c_new = f * c_prev + i * g
        h_new = o * jnp.tanh(c_new)
        return h_new, c_new

    # ---- Wavefront over (layer, t) diagonals: seq + n_layers - 1 serial steps ----------------
    for d in range(S + n_layers - 1):
        h_in = list(h)                       # snapshot: each diagonal reads only the previous one
        lo = max(0, d - (S - 1))
        hi = min(n_layers - 1, d)
        for l in range(lo, hi + 1):
            t = d - l
            if l == 0:
                # aligned full-vreg slice of the hoisted projection + one recurrent matmul
                gates = gx0[t * bp:(t + 1) * bp, :] + jnp.dot(
                    h_in[0].astype(jnp.bfloat16), w_rec[0],
                    preferred_element_type=jnp.float32)
            else:
                # fused input+recurrent projection: one MXU push per cell
                xh = jnp.concatenate([h_in[l - 1], h_in[l]], axis=1)    # (BP, 2H)
                gates = jnp.dot(xh.astype(jnp.bfloat16), w_rec[l],
                                preferred_element_type=jnp.float32) + bias[l]
            h[l], c[l] = lstm_cell(gates, c[l])

    # Final states written exactly once, as full aligned slabs (padded batch sliced in wrapper).
    hidden_ref[...] = jnp.concatenate(h, axis=0)                        # (n_layers*BP, H)
    cell_ref[...] = jnp.concatenate(c, axis=0)


def encoder_lstm(ids_pad, emb_bf16, lstm_inputs, *, seq_len, batch, bp, hid_dim,
                 n_layers, vocab):
    kernel = functools.partial(encoder_kernel, seq_len=seq_len, batch=batch, bp=bp,
                               hid_dim=hid_dim, n_layers=n_layers, vocab=vocab)
    vmem = pl.BlockSpec(memory_space=pltpu.MemorySpace.VMEM)
    n_in = 2 + len(lstm_inputs)

    hidden_flat, cell_flat = pl.pallas_call(
        kernel,
        out_shape=(jax.ShapeDtypeStruct((n_layers * bp, hid_dim), jnp.float32),
                   jax.ShapeDtypeStruct((n_layers * bp, hid_dim), jnp.float32)),
        in_specs=[vmem] * n_in,
        out_specs=(vmem, vmem),
    )(ids_pad, emb_bf16, *lstm_inputs)

    hidden = hidden_flat.reshape(n_layers, bp, hid_dim)[:, :batch]
    cell = cell_flat.reshape(n_layers, bp, hid_dim)[:, :batch]
    return hidden, cell


def encoder_forward(x_ids, params, hid_dim, bp=8):
    """Single fused Pallas launch: embedding gather + dropout(eval) + n-layer LSTM."""
    seq_len, batch = x_ids.shape
    assert batch <= bp
    vocab, _ = params["embedding"].shape
    n_layers = len(params["lstm"])

    # Pad the batch to one full sublane tile; padded lanes use token 0 and are discarded.
    ids_pad = jnp.zeros((seq_len, bp), jnp.int32).at[:, :batch].set(x_ids)
    ids_pad = ids_pad.reshape(seq_len * bp, 1)

    emb_bf16 = params["embedding"].astype(jnp.bfloat16)

    lstm_inputs = []
    l0 = params["lstm"][0]
    lstm_inputs += [l0["w_ih_t"].astype(jnp.bfloat16),
                    l0["w_hh_t"].astype(jnp.bfloat16),
                    l0["b"]]
    for l in range(1, n_layers):
        ly = params["lstm"][l]
        w_cat = jnp.concatenate([ly["w_ih_t"], ly["w_hh_t"]], axis=0)   # (2H, 4H)
        lstm_inputs += [w_cat.astype(jnp.bfloat16), ly["b"]]

    return encoder_lstm(ids_pad, emb_bf16, lstm_inputs, seq_len=seq_len, batch=batch,
                        bp=bp, hid_dim=hid_dim, n_layers=n_layers, vocab=vocab)


def init_encoder_params(key, input_dim, emb_dim, hid_dim, n_layers):
    keys = jax.random.split(key, 1 + 4 * n_layers)
    params = {"embedding": jax.random.normal(keys[0], (input_dim, emb_dim), jnp.float32),
              "lstm": []}
    k = 1.0 / jnp.sqrt(hid_dim)
    for layer in range(n_layers):
        in_dim = emb_dim if layer == 0 else hid_dim
        kw = keys[1 + 4 * layer: 1 + 4 * (layer + 1)]
        w_ih = jax.random.uniform(kw[0], (4 * hid_dim, in_dim), jnp.float32, -k, k)
        w_hh = jax.random.uniform(kw[1], (4 * hid_dim, hid_dim), jnp.float32, -k, k)
        b_ih = jax.random.uniform(kw[2], (4 * hid_dim,), jnp.float32, -k, k)
        b_hh = jax.random.uniform(kw[3], (4 * hid_dim,), jnp.float32, -k, k)
        params["lstm"].append({
            "w_ih_t": w_ih.T,                                  # (in_dim, 4H)
            "w_hh_t": w_hh.T,                                  # (H, 4H)
            "b": (b_ih + b_hh).reshape(1, 4 * hid_dim),        # (1, 4H)
        })
    return params


def encoder_forward_ref(x_ids, params, hid_dim, *, match_bf16):
    """Pure-JAX reference (lax.scan LSTM).  If match_bf16, dot inputs are cast to bf16 with
    f32 accumulation, matching the kernel's precision exactly."""
    dt = jnp.bfloat16 if match_bf16 else jnp.float32
    layer_in = jnp.take(params["embedding"], x_ids, axis=0)   # (S, B, E)
    h_list, c_list = [], []
    for layer in params["lstm"]:
        w_ih_t = layer["w_ih_t"].astype(dt)
        w_hh_t = layer["w_hh_t"].astype(dt)
        b = layer["b"]
        batch = layer_in.shape[1]

        def step(carry, x_t, w_ih_t=w_ih_t, w_hh_t=w_hh_t, b=b):
            h_prev, c_prev = carry
            gates = (jnp.dot(x_t.astype(dt), w_ih_t, preferred_element_type=jnp.float32)
                     + jnp.dot(h_prev.astype(dt), w_hh_t, preferred_element_type=jnp.float32)
                     + b)
            i, f, g, o = jnp.split(gates, 4, axis=-1)
            c = jax.nn.sigmoid(f) * c_prev + jax.nn.sigmoid(i) * jnp.tanh(g)
            h = jax.nn.sigmoid(o) * jnp.tanh(c)
            return (h, c), h

        init = (jnp.zeros((batch, hid_dim), jnp.float32),
                jnp.zeros((batch, hid_dim), jnp.float32))
        (h, c), outputs = jax.lax.scan(step, init, layer_in)
        h_list.append(h)
        c_list.append(c)
        layer_in = outputs
    return jnp.stack(h_list), jnp.stack(c_list)


if __name__ == "__main__":
    # Encoder(input_dim=50, emb_dim=32, hid_dim=32, n_layers=2, dropout=0.1), eval mode.
    input_dim, emb_dim, hid_dim, n_layers = 50, 32, 32, 2
    seq_len, batch = 8, 2

    root = jax.random.PRNGKey(0)
    k_params, k_ids = jax.random.split(root)
    params = init_encoder_params(k_params, input_dim, emb_dim, hid_dim, n_layers)
    x_ids = jax.random.randint(k_ids, (seq_len, batch), 0, input_dim, dtype=jnp.int32)

    hidden, cell = encoder_forward(x_ids, params, hid_dim)
    hidden, cell = jax.block_until_ready((hidden, cell))
    assert hidden.shape == (n_layers, batch, hid_dim)
    assert cell.shape == (n_layers, batch, hid_dim)

    # Tight check vs. a precision-matched (bf16 matmul inputs, f32 accumulation) reference.
    h_ref_m, c_ref_m = encoder_forward_ref(x_ids, params, hid_dim, match_bf16=True)
    assert jnp.allclose(hidden, h_ref_m, atol=2e-3, rtol=2e-3)
    assert jnp.allclose(cell, c_ref_m, atol=2e-3, rtol=2e-3)

    # Loose sanity check vs. the pure-f32 reference (only deviation is bf16 matmul inputs).
    h_ref_f, c_ref_f = encoder_forward_ref(x_ids, params, hid_dim, match_bf16=False)
    assert jnp.allclose(hidden, h_ref_f, atol=1e-1, rtol=1e-1)
    assert jnp.allclose(cell, c_ref_f, atol=1e-1, rtol=1e-1)

    print("KERNEL_OK")
</pallas_src>

<mosaic_0001>
module attributes {stable_mosaic.version = 11 : i64} {
  func.func @encoder_kernel(%arg0: memref<64x1xi32, #tpu.memory_space<vmem>>, %arg1: memref<50x32xbf16, #tpu.memory_space<vmem>>, %arg2: memref<32x128xbf16, #tpu.memory_space<vmem>>, %arg3: memref<32x128xbf16, #tpu.memory_space<vmem>>, %arg4: memref<1x128xf32, #tpu.memory_space<vmem>>, %arg5: memref<64x128xbf16, #tpu.memory_space<vmem>>, %arg6: memref<1x128xf32, #tpu.memory_space<vmem>>, %arg7: memref<16x32xf32, #tpu.memory_space<vmem>>, %arg8: memref<16x32xf32, #tpu.memory_space<vmem>>) attributes {dimension_semantics = [], scalar_prefetch = 0 : i64, scratch_operands = 0 : i64, tpu.core_type = #tpu.core_type<tc>} {
    %c0 = arith.constant 0 : index
    %c0_0 = arith.constant 0 : index
    %0 = vector.load %arg0[%c0, %c0_0] : memref<64x1xi32, #tpu.memory_space<vmem>>, vector<64x1xi32>
    %1 = tpu.iota {dimensions = array<i32: 1>} : vector<64x50xi32>
    %2 = vector.broadcast %0 : vector<64x1xi32> to vector<64x50xi32>
    %3 = arith.cmpi eq, %1, %2 : vector<64x50xi32>
    %4 = arith.extui %3 : vector<64x50xi1> to vector<64x50xi32>
    %5 = arith.sitofp %4 : vector<64x50xi32> to vector<64x50xf32>
    %6 = arith.truncf %5 : vector<64x50xf32> to vector<64x50xbf16>
    %c0_1 = arith.constant 0 : index
    %c0_2 = arith.constant 0 : index
    %7 = vector.load %arg1[%c0_1, %c0_2] : memref<50x32xbf16, #tpu.memory_space<vmem>>, vector<50x32xbf16>
    %cst = arith.constant dense<0.000000e+00> : vector<64x32xf32>
    %8 = tpu.matmul %6, %7, %cst {dimension_numbers = #tpu.dot_dimension_numbers<[1], [0], [0], [1], [0, 0, 1, 1], [], []>} : vector<64x50xbf16>, vector<50x32xbf16>, vector<64x32xf32> -> vector<64x32xf32>
    %c0_3 = arith.constant 0 : index
    %c0_4 = arith.constant 0 : index
    %9 = vector.load %arg2[%c0_3, %c0_4] : memref<32x128xbf16, #tpu.memory_space<vmem>>, vector<32x128xbf16>
    %c0_5 = arith.constant 0 : index
    %c0_6 = arith.constant 0 : index
    %10 = vector.load %arg4[%c0_5, %c0_6] : memref<1x128xf32, #tpu.memory_space<vmem>>, vector<1x128xf32>
    %11 = arith.truncf %8 : vector<64x32xf32> to vector<64x32xbf16>
    %cst_7 = arith.constant dense<0.000000e+00> : vector<64x128xf32>
    %12 = tpu.matmul %11, %9, %cst_7 {dimension_numbers = #tpu.dot_dimension_numbers<[1], [0], [0], [1], [0, 0, 1, 1], [], []>} : vector<64x32xbf16>, vector<32x128xbf16>, vector<64x128xf32> -> vector<64x128xf32>
    %13 = vector.broadcast %10 : vector<1x128xf32> to vector<64x128xf32>
    %14 = arith.addf %12, %13 : vector<64x128xf32>
    %c0_8 = arith.constant 0 : index
    %c0_9 = arith.constant 0 : index
    %15 = vector.load %arg3[%c0_8, %c0_9] : memref<32x128xbf16, #tpu.memory_space<vmem>>, vector<32x128xbf16>
    %c0_10 = arith.constant 0 : index
    %c0_11 = arith.constant 0 : index
    %16 = vector.load %arg5[%c0_10, %c0_11] : memref<64x128xbf16, #tpu.memory_space<vmem>>, vector<64x128xbf16>
    %c0_12 = arith.constant 0 : index
    %c0_13 = arith.constant 0 : index
    %17 = vector.load %arg6[%c0_12, %c0_13] : memref<1x128xf32, #tpu.memory_space<vmem>>, vector<1x128xf32>
    %cst_14 = arith.constant 0.000000e+00 : f32
    %18 = vector.broadcast %cst_14 : f32 to vector<8x32xf32>
    %cst_15 = arith.constant 0.000000e+00 : f32
    %19 = vector.broadcast %cst_15 : f32 to vector<8x32xf32>
    %cst_16 = arith.constant 0.000000e+00 : f32
    %20 = vector.broadcast %cst_16 : f32 to vector<8x32xf32>
    %cst_17 = arith.constant 0.000000e+00 : f32
    %21 = vector.broadcast %cst_17 : f32 to vector<8x32xf32>
    %22 = vector.extract_strided_slice %14 {offsets = [0, 0], sizes = [8, 128], strides = [1, 1]} : vector<64x128xf32> to vector<8x128xf32>
    %23 = arith.truncf %18 : vector<8x32xf32> to vector<8x32xbf16>
    %cst_18 = arith.constant dense<0.000000e+00> : vector<8x128xf32>
    %24 = tpu.matmul %23, %15, %cst_18 {dimension_numbers = #tpu.dot_dimension_numbers<[1], [0], [0], [1], [0, 0, 1, 1], [], []>} : vector<8x32xbf16>, vector<32x128xbf16>, vector<8x128xf32> -> vector<8x128xf32>
    %25 = arith.addf %22, %24 : vector<8x128xf32>
    %26 = arith.negf %25 : vector<8x128xf32>
    %27 = math.exp %26 : vector<8x128xf32>
    %cst_19 = arith.constant 1.000000e+00 : f32
    %28 = vector.broadcast %cst_19 : f32 to vector<8x128xf32>
    %29 = arith.addf %28, %27 : vector<8x128xf32>
    %30 = arith.divf %28, %29 : vector<8x128xf32>
    %31 = vector.extract_strided_slice %30 {offsets = [0, 0], sizes = [8, 32], strides = [1, 1]} : vector<8x128xf32> to vector<8x32xf32>
    %32 = vector.extract_strided_slice %30 {offsets = [0, 32], sizes = [8, 32], strides = [1, 1]} : vector<8x128xf32> to vector<8x32xf32>
    %33 = vector.extract_strided_slice %30 {offsets = [0, 96], sizes = [8, 32], strides = [1, 1]} : vector<8x128xf32> to vector<8x32xf32>
    %34 = vector.extract_strided_slice %25 {offsets = [0, 64], sizes = [8, 32], strides = [1, 1]} : vector<8x128xf32> to vector<8x32xf32>
    %35 = math.tanh %34 : vector<8x32xf32>
    %36 = arith.mulf %32, %20 : vector<8x32xf32>
    %37 = arith.mulf %31, %35 : vector<8x32xf32>
    %38 = arith.addf %36, %37 : vector<8x32xf32>
    %39 = math.tanh %38 : vector<8x32xf32>
    %40 = arith.mulf %33, %39 : vector<8x32xf32>
    %41 = vector.extract_strided_slice %14 {offsets = [8, 0], sizes = [8, 128], strides = [1, 1]} : vector<64x128xf32> to vector<8x128xf32>
    %42 = arith.truncf %40 : vector<8x32xf32> to vector<8x32xbf16>
    %cst_20 = arith.constant dense<0.000000e+00> : vector<8x128xf32>
    %43 = tpu.matmul %42, %15, %cst_20 {dimension_numbers = #tpu.dot_dimension_numbers<[1], [0], [0], [1], [0, 0, 1, 1], [], []>} : vector<8x32xbf16>, vector<32x128xbf16>, vector<8x128xf32> -> vector<8x128xf32>
    %44 = arith.addf %41, %43 : vector<8x128xf32>
    %45 = arith.negf %44 : vector<8x128xf32>
    %46 = math.exp %45 : vector<8x128xf32>
    %cst_21 = arith.constant 1.000000e+00 : f32
    %47 = vector.broadcast %cst_21 : f32 to vector<8x128xf32>
    %48 = arith.addf %47, %46 : vector<8x128xf32>
    %49 = arith.divf %47, %48 : vector<8x128xf32>
    %50 = vector.extract_strided_slice %49 {offsets = [0, 0], sizes = [8, 32], strides = [1, 1]} : vector<8x128xf32> to vector<8x32xf32>
    %51 = vector.extract_strided_slice %49 {offsets = [0, 32], sizes = [8, 32], strides = [1, 1]} : vector<8x128xf32> to vector<8x32xf32>
    %52 = vector.extract_strided_slice %49 {offsets = [0, 96], sizes = [8, 32], strides = [1, 1]} : vector<8x128xf32> to vector<8x32xf32>
    %53 = vector.extract_strided_slice %44 {offsets = [0, 64], sizes = [8, 32], strides = [1, 1]} : vector<8x128xf32> to vector<8x32xf32>
    %54 = math.tanh %53 : vector<8x32xf32>
    %55 = arith.mulf %51, %38 : vector<8x32xf32>
    %56 = arith.mulf %50, %54 : vector<8x32xf32>
    %57 = arith.addf %55, %56 : vector<8x32xf32>
    %58 = math.tanh %57 : vector<8x32xf32>
    %59 = arith.mulf %52, %58 : vector<8x32xf32>
    %60 = tpu.concatenate %40, %19 in 1 : vector<8x32xf32>, vector<8x32xf32> -> vector<8x64xf32>
    %61 = arith.truncf %60 : vector<8x64xf32> to vector<8x64xbf16>
    %cst_22 = arith.constant dense<0.000000e+00> : vector<8x128xf32>
    %62 = tpu.matmul %61, %16, %cst_22 {dimension_numbers = #tpu.dot_dimension_numbers<[1], [0], [0], [1], [0, 0, 1, 1], [], []>} : vector<8x64xbf16>, vector<64x128xbf16>, vector<8x128xf32> -> vector<8x128xf32>
    %63 = vector.broadcast %17 : vector<1x128xf32> to vector<8x128xf32>
    %64 = arith.addf %62, %63 : vector<8x128xf32>
    %65 = arith.negf %64 : vector<8x128xf32>
    %66 = math.exp %65 : vector<8x128xf32>
    %cst_23 = arith.constant 1.000000e+00 : f32
    %67 = vector.broadcast %cst_23 : f32 to vector<8x128xf32>
    %68 = arith.addf %67, %66 : vector<8x128xf32>
    %69 = arith.divf %67, %68 : vector<8x128xf32>
    %70 = vector.extract_strided_slice %69 {offsets = [0, 0], sizes = [8, 32], strides = [1, 1]} : vector<8x128xf32> to vector<8x32xf32>
    %71 = vector.extract_strided_slice %69 {offsets = [0, 32], sizes = [8, 32], strides = [1, 1]} : vector<8x128xf32> to vector<8x32xf32>
    %72 = vector.extract_strided_slice %69 {offsets = [0, 96], sizes = [8, 32], strides = [1, 1]} : vector<8x128xf32> to vector<8x32xf32>
    %73 = vector.extract_strided_slice %64 {offsets = [0, 64], sizes = [8, 32], strides = [1, 1]} : vector<8x128xf32> to vector<8x32xf32>
    %74 = math.tanh %73 : vector<8x32xf32>
    %75 = arith.mulf %71, %21 : vector<8x32xf32>
    %76 = arith.mulf %70, %74 : vector<8x32xf32>
    %77 = arith.addf %75, %76 : vector<8x32xf32>
    %78 = math.tanh %77 : vector<8x32xf32>
    %79 = arith.mulf %72, %78 : vector<8x32xf32>
    %80 = vector.extract_strided_slice %14 {offsets = [16, 0], sizes = [8, 128], strides = [1, 1]} : vector<64x128xf32> to vector<8x128xf32>
    %81 = arith.truncf %59 : vector<8x32xf32> to vector<8x32xbf16>
    %cst_24 = arith.constant dense<0.000000e+00> : vector<8x128xf32>
    %82 = tpu.matmul %81, %15, %cst_24 {dimension_numbers = #tpu.dot_dimension_numbers<[1], [0], [0], [1], [0, 0, 1, 1], [], []>} : vector<8x32xbf16>, vector<32x128xbf16>, vector<8x128xf32> -> vector<8x128xf32>
    %83 = arith.addf %80, %82 : vector<8x128xf32>
    %84 = arith.negf %83 : vector<8x128xf32>
    %85 = math.exp %84 : vector<8x128xf32>
    %cst_25 = arith.constant 1.000000e+00 : f32
    %86 = vector.broadcast %cst_25 : f32 to vector<8x128xf32>
    %87 = arith.addf %86, %85 : vector<8x128xf32>
    %88 = arith.divf %86, %87 : vector<8x128xf32>
    %89 = vector.extract_strided_slice %88 {offsets = [0, 0], sizes = [8, 32], strides = [1, 1]} : vector<8x128xf32> to vector<8x32xf32>
    %90 = vector.extract_strided_slice %88 {offsets = [0, 32], sizes = [8, 32], strides = [1, 1]} : vector<8x128xf32> to vector<8x32xf32>
    %91 = vector.extract_strided_slice %88 {offsets = [0, 96], sizes = [8, 32], strides = [1, 1]} : vector<8x128xf32> to vector<8x32xf32>
    %92 = vector.extract_strided_slice %83 {offsets = [0, 64], sizes = [8, 32], strides = [1, 1]} : vector<8x128xf32> to vector<8x32xf32>
    %93 = math.tanh %92 : vector<8x32xf32>
    %94 = arith.mulf %90, %57 : vector<8x32xf32>
    %95 = arith.mulf %89, %93 : vector<8x32xf32>
    %96 = arith.addf %94, %95 : vector<8x32xf32>
    %97 = math.tanh %96 : vector<8x32xf32>
    %98 = arith.mulf %91, %97 : vector<8x32xf32>
    %99 = tpu.concatenate %59, %79 in 1 : vector<8x32xf32>, vector<8x32xf32> -> vector<8x64xf32>
    %100 = arith.truncf %99 : vector<8x64xf32> to vector<8x64xbf16>
    %cst_26 = arith.constant dense<0.000000e+00> : vector<8x128xf32>
    %101 = tpu.matmul %100, %16, %cst_26 {dimension_numbers = #tpu.dot_dimension_numbers<[1], [0], [0], [1], [0, 0, 1, 1], [], []>} : vector<8x64xbf16>, vector<64x128xbf16>, vector<8x128xf32> -> vector<8x128xf32>
    %102 = vector.broadcast %17 : vector<1x128xf32> to vector<8x128xf32>
    %103 = arith.addf %101, %102 : vector<8x128xf32>
    %104 = arith.negf %103 : vector<8x128xf32>
    %105 = math.exp %104 : vector<8x128xf32>
    %cst_27 = arith.constant 1.000000e+00 : f32
    %106 = vector.broadcast %cst_27 : f32 to vector<8x128xf32>
    %107 = arith.addf %106, %105 : vector<8x128xf32>
    %108 = arith.divf %106, %107 : vector<8x128xf32>
    %109 = vector.extract_strided_slice %108 {offsets = [0, 0], sizes = [8, 32], strides = [1, 1]} : vector<8x128xf32> to vector<8x32xf32>
    %110 = vector.extract_strided_slice %108 {offsets = [0, 32], sizes = [8, 32], strides = [1, 1]} : vector<8x128xf32> to vector<8x32xf32>
    %111 = vector.extract_strided_slice %108 {offsets = [0, 96], sizes = [8, 32], strides = [1, 1]} : vector<8x128xf32> to vector<8x32xf32>
    %112 = vector.extract_strided_slice %103 {offsets = [0, 64], sizes = [8, 32], strides = [1, 1]} : vector<8x128xf32> to vector<8x32xf32>
    %113 = math.tanh %112 : vector<8x32xf32>
    %114 = arith.mulf %110, %77 : vector<8x32xf32>
    %115 = arith.mulf %109, %113 : vector<8x32xf32>
    %116 = arith.addf %114, %115 : vector<8x32xf32>
    %117 = math.tanh %116 : vector<8x32xf32>
    %118 = arith.mulf %111, %117 : vector<8x32xf32>
    %119 = vector.extract_strided_slice %14 {offsets = [24, 0], sizes = [8, 128], strides = [1, 1]} : vector<64x128xf32> to vector<8x128xf32>
    %120 = arith.truncf %98 : vector<8x32xf32> to vector<8x32xbf16>
    %cst_28 = arith.constant dense<0.000000e+00> : vector<8x128xf32>
    %121 = tpu.matmul %120, %15, %cst_28 {dimension_numbers = #tpu.dot_dimension_numbers<[1], [0], [0], [1], [0, 0, 1, 1], [], []>} : vector<8x32xbf16>, vector<32x128xbf16>, vector<8x128xf32> -> vector<8x128xf32>
    %122 = arith.addf %119, %121 : vector<8x128xf32>
    %123 = arith.negf %122 : vector<8x128xf32>
    %124 = math.exp %123 : vector<8x128xf32>
    %cst_29 = arith.constant 1.000000e+00 : f32
    %125 = vector.broadcast %cst_29 : f32 to vector<8x128xf32>
    %126 = arith.addf %125, %124 : vector<8x128xf32>
    %127 = arith.divf %125, %126 : vector<8x128xf32>
    %128 = vector.extract_strided_slice %127 {offsets = [0, 0], sizes = [8, 32], strides = [1, 1]} : vector<8x128xf32> to vector<8x32xf32>
    %129 = vector.extract_strided_slice %127 {offsets = [0, 32], sizes = [8, 32], strides = [1, 1]} : vector<8x128xf32> to vector<8x32xf32>
    %130 = vector.extract_strided_slice %127 {offsets = [0, 96], sizes = [8, 32], strides = [1, 1]} : vector<8x128xf32> to vector<8x32xf32>
    %131 = vector.extract_strided_slice %122 {offsets = [0, 64], sizes = [8, 32], strides = [1, 1]} : vector<8x128xf32> to vector<8x32xf32>
    %132 = math.tanh %131 : vector<8x32xf32>
    %133 = arith.mulf %129, %96 : vector<8x32xf32>
    %134 = arith.mulf %128, %132 : vector<8x32xf32>
    %135 = arith.addf %133, %134 : vector<8x32xf32>
    %136 = math.tanh %135 : vector<8x32xf32>
    %137 = arith.mulf %130, %136 : vector<8x32xf32>
    %138 = tpu.concatenate %98, %118 in 1 : vector<8x32xf32>, vector<8x32xf32> -> vector<8x64xf32>
    %139 = arith.truncf %138 : vector<8x64xf32> to vector<8x64xbf16>
    %cst_30 = arith.constant dense<0.000000e+00> : vector<8x128xf32>
    %140 = tpu.matmul %139, %16, %cst_30 {dimension_numbers = #tpu.dot_dimension_numbers<[1], [0], [0], [1], [0, 0, 1, 1], [], []>} : vector<8x64xbf16>, vector<64x128xbf16>, vector<8x128xf32> -> vector<8x128xf32>
    %141 = vector.broadcast %17 : vector<1x128xf32> to vector<8x128xf32>
    %142 = arith.addf %140, %141 : vector<8x128xf32>
    %143 = arith.negf %142 : vector<8x128xf32>
    %144 = math.exp %143 : vector<8x128xf32>
    %cst_31 = arith.constant 1.000000e+00 : f32
    %145 = vector.broadcast %cst_31 : f32 to vector<8x128xf32>
    %146 = arith.addf %145, %144 : vector<8x128xf32>
    %147 = arith.divf %145, %146 : vector<8x128xf32>
    %148 = vector.extract_strided_slice %147 {offsets = [0, 0], sizes = [8, 32], strides = [1, 1]} : vector<8x128xf32> to vector<8x32xf32>
    %149 = vector.extract_strided_slice %147 {offsets = [0, 32], sizes = [8, 32], strides = [1, 1]} : vector<8x128xf32> to vector<8x32xf32>
    %150 = vector.extract_strided_slice %147 {offsets = [0, 96], sizes = [8, 32], strides = [1, 1]} : vector<8x128xf32> to vector<8x32xf32>
    %151 = vector.extract_strided_slice %142 {offsets = [0, 64], sizes = [8, 32], strides = [1, 1]} : vector<8x128xf32> to vector<8x32xf32>
    %152 = math.tanh %151 : vector<8x32xf32>
    %153 = arith.mulf %149, %116 : vector<8x32xf32>
    %154 = arith.mulf %148, %152 : vector<8x32xf32>
    %155 = arith.addf %153, %154 : vector<8x32xf32>
    %156 = math.tanh %155 : vector<8x32xf32>
    %157 = arith.mulf %150, %156 : vector<8x32xf32>
    %158 = vector.extract_strided_slice %14 {offsets = [32, 0], sizes = [8, 128], strides = [1, 1]} : vector<64x128xf32> to vector<8x128xf32>
    %159 = arith.truncf %137 : vector<8x32xf32> to vector<8x32xbf16>
    %cst_32 = arith.constant dense<0.000000e+00> : vector<8x128xf32>
    %160 = tpu.matmul %159, %15, %cst_32 {dimension_numbers = #tpu.dot_dimension_numbers<[1], [0], [0], [1], [0, 0, 1, 1], [], []>} : vector<8x32xbf16>, vector<32x128xbf16>, vector<8x128xf32> -> vector<8x128xf32>
    %161 = arith.addf %158, %160 : vector<8x128xf32>
    %162 = arith.negf %161 : vector<8x128xf32>
    %163 = math.exp %162 : vector<8x128xf32>
    %cst_33 = arith.constant 1.000000e+00 : f32
    %164 = vector.broadcast %cst_33 : f32 to vector<8x128xf32>
    %165 = arith.addf %164, %163 : vector<8x128xf32>
    %166 = arith.divf %164, %165 : vector<8x128xf32>
    %167 = vector.extract_strided_slice %166 {offsets = [0, 0], sizes = [8, 32], strides = [1, 1]} : vector<8x128xf32> to vector<8x32xf32>
    %168 = vector.extract_strided_slice %166 {offsets = [0, 32], sizes = [8, 32], strides = [1, 1]} : vector<8x128xf32> to vector<8x32xf32>
    %169 = vector.extract_strided_slice %166 {offsets = [0, 96], sizes = [8, 32], strides = [1, 1]} : vector<8x128xf32> to vector<8x32xf32>
    %170 = vector.extract_strided_slice %161 {offsets = [0, 64], sizes = [8, 32], strides = [1, 1]} : vector<8x128xf32> to vector<8x32xf32>
    %171 = math.tanh %170 : vector<8x32xf32>
    %172 = arith.mulf %168, %135 : vector<8x32xf32>
    %173 = arith.mulf %167, %171 : vector<8x32xf32>
    %174 = arith.addf %172, %173 : vector<8x32xf32>
    %175 = math.tanh %174 : vector<8x32xf32>
    %176 = arith.mulf %169, %175 : vector<8x32xf32>
    %177 = tpu.concatenate %137, %157 in 1 : vector<8x32xf32>, vector<8x32xf32> -> vector<8x64xf32>
    %178 = arith.truncf %177 : vector<8x64xf32> to vector<8x64xbf16>
    %cst_34 = arith.constant dense<0.000000e+00> : vector<8x128xf32>
    %179 = tpu.matmul %178, %16, %cst_34 {dimension_numbers = #tpu.dot_dimension_numbers<[1], [0], [0], [1], [0, 0, 1, 1], [], []>} : vector<8x64xbf16>, vector<64x128xbf16>, vector<8x128xf32> -> vector<8x128xf32>
    %180 = vector.broadcast %17 : vector<1x128xf32> to vector<8x128xf32>
    %181 = arith.addf %179, %180 : vector<8x128xf32>
    %182 = arith.negf %181 : vector<8x128xf32>
    %183 = math.exp %182 : vector<8x128xf32>
    %cst_35 = arith.constant 1.000000e+00 : f32
    %184 = vector.broadcast %cst_35 : f32 to vector<8x128xf32>
    %185 = arith.addf %184, %183 : vector<8x128xf32>
    %186 = arith.divf %184, %185 : vector<8x128xf32>
    %187 = vector.extract_strided_slice %186 {offsets = [0, 0], sizes = [8, 32], strides = [1, 1]} : vector<8x128xf32> to vector<8x32xf32>
    %188 = vector.extract_strided_slice %186 {offsets = [0, 32], sizes = [8, 32], strides = [1, 1]} : vector<8x128xf32> to vector<8x32xf32>
    %189 = vector.extract_strided_slice %186 {offsets = [0, 96], sizes = [8, 32], strides = [1, 1]} : vector<8x128xf32> to vector<8x32xf32>
    %190 = vector.extract_strided_slice %181 {offsets = [0, 64], sizes = [8, 32], strides = [1, 1]} : vector<8x128xf32> to vector<8x32xf32>
    %191 = math.tanh %190 : vector<8x32xf32>
    %192 = arith.mulf %188, %155 : vector<8x32xf32>
    %193 = arith.mulf %187, %191 : vector<8x32xf32>
    %194 = arith.addf %192, %193 : vector<8x32xf32>
    %195 = math.tanh %194 : vector<8x32xf32>
    %196 = arith.mulf %189, %195 : vector<8x32xf32>
    %197 = vector.extract_strided_slice %14 {offsets = [40, 0], sizes = [8, 128], strides = [1, 1]} : vector<64x128xf32> to vector<8x128xf32>
    %198 = arith.truncf %176 : vector<8x32xf32> to vector<8x32xbf16>
    %cst_36 = arith.constant dense<0.000000e+00> : vector<8x128xf32>
    %199 = tpu.matmul %198, %15, %cst_36 {dimension_numbers = #tpu.dot_dimension_numbers<[1], [0], [0], [1], [0, 0, 1, 1], [], []>} : vector<8x32xbf16>, vector<32x128xbf16>, vector<8x128xf32> -> vector<8x128xf32>
    %200 = arith.addf %197, %199 : vector<8x128xf32>
    %201 = arith.negf %200 : vector<8x128xf32>
    %202 = math.exp %201 : vector<8x128xf32>
    %cst_37 = arith.constant 1.000000e+00 : f32
    %203 = vector.broadcast %cst_37 : f32 to vector<8x128xf32>
    %204 = arith.addf %203, %202 : vector<8x128xf32>
    %205 = arith.divf %203, %204 : vector<8x128xf32>
    %206 = vector.extract_strided_slice %205 {offsets = [0, 0], sizes = [8, 32], strides = [1, 1]} : vector<8x128xf32> to vector<8x32xf32>
    %207 = vector.extract_strided_slice %205 {offsets = [0, 32], sizes = [8, 32], strides = [1, 1]} : vector<8x128xf32> to vector<8x32xf32>
    %208 = vector.extract_strided_slice %205 {offsets = [0, 96], sizes = [8, 32], strides = [1, 1]} : vector<8x128xf32> to vector<8x32xf32>
    %209 = vector.extract_strided_slice %200 {offsets = [0, 64], sizes = [8, 32], strides = [1, 1]} : vector<8x128xf32> to vector<8x32xf32>
    %210 = math.tanh %209 : vector<8x32xf32>
    %211 = arith.mulf %207, %174 : vector<8x32xf32>
    %212 = arith.mulf %206, %210 : vector<8x32xf32>
    %213 = arith.addf %211, %212 : vector<8x32xf32>
    %214 = math.tanh %213 : vector<8x32xf32>
    %215 = arith.mulf %208, %214 : vector<8x32xf32>
    %216 = tpu.concatenate %176, %196 in 1 : vector<8x32xf32>, vector<8x32xf32> -> vector<8x64xf32>
    %217 = arith.truncf %216 : vector<8x64xf32> to vector<8x64xbf16>
    %cst_38 = arith.constant dense<0.000000e+00> : vector<8x128xf32>
    %218 = tpu.matmul %217, %16, %cst_38 {dimension_numbers = #tpu.dot_dimension_numbers<[1], [0], [0], [1], [0, 0, 1, 1], [], []>} : vector<8x64xbf16>, vector<64x128xbf16>, vector<8x128xf32> -> vector<8x128xf32>
    %219 = vector.broadcast %17 : vector<1x128xf32> to vector<8x128xf32>
    %220 = arith.addf %218, %219 : vector<8x128xf32>
    %221 = arith.negf %220 : vector<8x128xf32>
    %222 = math.exp %221 : vector<8x128xf32>
    %cst_39 = arith.constant 1.000000e+00 : f32
    %223 = vector.broadcast %cst_39 : f32 to vector<8x128xf32>
    %224 = arith.addf %223, %222 : vector<8x128xf32>
    %225 = arith.divf %223, %224 : vector<8x128xf32>
    %226 = vector.extract_strided_slice %225 {offsets = [0, 0], sizes = [8, 32], strides = [1, 1]} : vector<8x128xf32> to vector<8x32xf32>
    %227 = vector.extract_strided_slice %225 {offsets = [0, 32], sizes = [8, 32], strides = [1, 1]} : vector<8x128xf32> to vector<8x32xf32>
    %228 = vector.extract_strided_slice %225 {offsets = [0, 96], sizes = [8, 32], strides = [1, 1]} : vector<8x128xf32> to vector<8x32xf32>
    %229 = vector.extract_strided_slice %220 {offsets = [0, 64], sizes = [8, 32], strides = [1, 1]} : vector<8x128xf32> to vector<8x32xf32>
    %230 = math.tanh %229 : vector<8x32xf32>
    %231 = arith.mulf %227, %194 : vector<8x32xf32>
    %232 = arith.mulf %226, %230 : vector<8x32xf32>
    %233 = arith.addf %231, %232 : vector<8x32xf32>
    %234 = math.tanh %233 : vector<8x32xf32>
    %235 = arith.mulf %228, %234 : vector<8x32xf32>
    %236 = vector.extract_strided_slice %14 {offsets = [48, 0], sizes = [8, 128], strides = [1, 1]} : vector<64x128xf32> to vector<8x128xf32>
    %237 = arith.truncf %215 : vector<8x32xf32> to vector<8x32xbf16>
    %cst_40 = arith.constant dense<0.000000e+00> : vector<8x128xf32>
    %238 = tpu.matmul %237, %15, %cst_40 {dimension_numbers = #tpu.dot_dimension_numbers<[1], [0], [0], [1], [0, 0, 1, 1], [], []>} : vector<8x32xbf16>, vector<32x128xbf16>, vector<8x128xf32> -> vector<8x128xf32>
    %239 = arith.addf %236, %238 : vector<8x128xf32>
    %240 = arith.negf %239 : vector<8x128xf32>
    %241 = math.exp %240 : vector<8x128xf32>
    %cst_41 = arith.constant 1.000000e+00 : f32
    %242 = vector.broadcast %cst_41 : f32 to vector<8x128xf32>
    %243 = arith.addf %242, %241 : vector<8x128xf32>
    %244 = arith.divf %242, %243 : vector<8x128xf32>
    %245 = vector.extract_strided_slice %244 {offsets = [0, 0], sizes = [8, 32], strides = [1, 1]} : vector<8x128xf32> to vector<8x32xf32>
    %246 = vector.extract_strided_slice %244 {offsets = [0, 32], sizes = [8, 32], strides = [1, 1]} : vector<8x128xf32> to vector<8x32xf32>
    %247 = vector.extract_strided_slice %244 {offsets = [0, 96], sizes = [8, 32], strides = [1, 1]} : vector<8x128xf32> to vector<8x32xf32>
    %248 = vector.extract_strided_slice %239 {offsets = [0, 64], sizes = [8, 32], strides = [1, 1]} : vector<8x128xf32> to vector<8x32xf32>
    %249 = math.tanh %248 : vector<8x32xf32>
    %250 = arith.mulf %246, %213 : vector<8x32xf32>
    %251 = arith.mulf %245, %249 : vector<8x32xf32>
    %252 = arith.addf %250, %251 : vector<8x32xf32>
    %253 = math.tanh %252 : vector<8x32xf32>
    %254 = arith.mulf %247, %253 : vector<8x32xf32>
    %255 = tpu.concatenate %215, %235 in 1 : vector<8x32xf32>, vector<8x32xf32> -> vector<8x64xf32>
    %256 = arith.truncf %255 : vector<8x64xf32> to vector<8x64xbf16>
    %cst_42 = arith.constant dense<0.000000e+00> : vector<8x128xf32>
    %257 = tpu.matmul %256, %16, %cst_42 {dimension_numbers = #tpu.dot_dimension_numbers<[1], [0], [0], [1], [0, 0, 1, 1], [], []>} : vector<8x64xbf16>, vector<64x128xbf16>, vector<8x128xf32> -> vector<8x128xf32>
    %258 = vector.broadcast %17 : vector<1x128xf32> to vector<8x128xf32>
    %259 = arith.addf %257, %258 : vector<8x128xf32>
    %260 = arith.negf %259 : vector<8x128xf32>
    %261 = math.exp %260 : vector<8x128xf32>
    %cst_43 = arith.constant 1.000000e+00 : f32
    %262 = vector.broadcast %cst_43 : f32 to vector<8x128xf32>
    %263 = arith.addf %262, %261 : vector<8x128xf32>
    %264 = arith.divf %262, %263 : vector<8x128xf32>
    %265 = vector.extract_strided_slice %264 {offsets = [0, 0], sizes = [8, 32], strides = [1, 1]} : vector<8x128xf32> to vector<8x32xf32>
    %266 = vector.extract_strided_slice %264 {offsets = [0, 32], sizes = [8, 32], strides = [1, 1]} : vector<8x128xf32> to vector<8x32xf32>
    %267 = vector.extract_strided_slice %264 {offsets = [0, 96], sizes = [8, 32], strides = [1, 1]} : vector<8x128xf32> to vector<8x32xf32>
    %268 = vector.extract_strided_slice %259 {offsets = [0, 64], sizes = [8, 32], strides = [1, 1]} : vector<8x128xf32> to vector<8x32xf32>
    %269 = math.tanh %268 : vector<8x32xf32>
    %270 = arith.mulf %266, %233 : vector<8x32xf32>
    %271 = arith.mulf %265, %269 : vector<8x32xf32>
    %272 = arith.addf %270, %271 : vector<8x32xf32>
    %273 = math.tanh %272 : vector<8x32xf32>
    %274 = arith.mulf %267, %273 : vector<8x32xf32>
    %275 = vector.extract_strided_slice %14 {offsets = [56, 0], sizes = [8, 128], strides = [1, 1]} : vector<64x128xf32> to vector<8x128xf32>
    %276 = arith.truncf %254 : vector<8x32xf32> to vector<8x32xbf16>
    %cst_44 = arith.constant dense<0.000000e+00> : vector<8x128xf32>
    %277 = tpu.matmul %276, %15, %cst_44 {dimension_numbers = #tpu.dot_dimension_numbers<[1], [0], [0], [1], [0, 0, 1, 1], [], []>} : vector<8x32xbf16>, vector<32x128xbf16>, vector<8x128xf32> -> vector<8x128xf32>
    %278 = arith.addf %275, %277 : vector<8x128xf32>
    %279 = arith.negf %278 : vector<8x128xf32>
    %280 = math.exp %279 : vector<8x128xf32>
    %cst_45 = arith.constant 1.000000e+00 : f32
    %281 = vector.broadcast %cst_45 : f32 to vector<8x128xf32>
    %282 = arith.addf %281, %280 : vector<8x128xf32>
    %283 = arith.divf %281, %282 : vector<8x128xf32>
    %284 = vector.extract_strided_slice %283 {offsets = [0, 0], sizes = [8, 32], strides = [1, 1]} : vector<8x128xf32> to vector<8x32xf32>
    %285 = vector.extract_strided_slice %283 {offsets = [0, 32], sizes = [8, 32], strides = [1, 1]} : vector<8x128xf32> to vector<8x32xf32>
    %286 = vector.extract_strided_slice %283 {offsets = [0, 96], sizes = [8, 32], strides = [1, 1]} : vector<8x128xf32> to vector<8x32xf32>
    %287 = vector.extract_strided_slice %278 {offsets = [0, 64], sizes = [8, 32], strides = [1, 1]} : vector<8x128xf32> to vector<8x32xf32>
    %288 = math.tanh %287 : vector<8x32xf32>
    %289 = arith.mulf %285, %252 : vector<8x32xf32>
    %290 = arith.mulf %284, %288 : vector<8x32xf32>
    %291 = arith.addf %289, %290 : vector<8x32xf32>
    %292 = math.tanh %291 : vector<8x32xf32>
    %293 = arith.mulf %286, %292 : vector<8x32xf32>
    %294 = tpu.concatenate %254, %274 in 1 : vector<8x32xf32>, vector<8x32xf32> -> vector<8x64xf32>
    %295 = arith.truncf %294 : vector<8x64xf32> to vector<8x64xbf16>
    %cst_46 = arith.constant dense<0.000000e+00> : vector<8x128xf32>
    %296 = tpu.matmul %295, %16, %cst_46 {dimension_numbers = #tpu.dot_dimension_numbers<[1], [0], [0], [1], [0, 0, 1, 1], [], []>} : vector<8x64xbf16>, vector<64x128xbf16>, vector<8x128xf32> -> vector<8x128xf32>
    %297 = vector.broadcast %17 : vector<1x128xf32> to vector<8x128xf32>
    %298 = arith.addf %296, %297 : vector<8x128xf32>
    %299 = arith.negf %298 : vector<8x128xf32>
    %300 = math.exp %299 : vector<8x128xf32>
    %cst_47 = arith.constant 1.000000e+00 : f32
    %301 = vector.broadcast %cst_47 : f32 to vector<8x128xf32>
    %302 = arith.addf %301, %300 : vector<8x128xf32>
    %303 = arith.divf %301, %302 : vector<8x128xf32>
    %304 = vector.extract_strided_slice %303 {offsets = [0, 0], sizes = [8, 32], strides = [1, 1]} : vector<8x128xf32> to vector<8x32xf32>
    %305 = vector.extract_strided_slice %303 {offsets = [0, 32], sizes = [8, 32], strides = [1, 1]} : vector<8x128xf32> to vector<8x32xf32>
    %306 = vector.extract_strided_slice %303 {offsets = [0, 96], sizes = [8, 32], strides = [1, 1]} : vector<8x128xf32> to vector<8x32xf32>
    %307 = vector.extract_strided_slice %298 {offsets = [0, 64], sizes = [8, 32], strides = [1, 1]} : vector<8x128xf32> to vector<8x32xf32>
    %308 = math.tanh %307 : vector<8x32xf32>
    %309 = arith.mulf %305, %272 : vector<8x32xf32>
    %310 = arith.mulf %304, %308 : vector<8x32xf32>
    %311 = arith.addf %309, %310 : vector<8x32xf32>
    %312 = math.tanh %311 : vector<8x32xf32>
    %313 = arith.mulf %306, %312 : vector<8x32xf32>
    %314 = tpu.concatenate %293, %313 in 1 : vector<8x32xf32>, vector<8x32xf32> -> vector<8x64xf32>
    %315 = arith.truncf %314 : vector<8x64xf32> to vector<8x64xbf16>
    %cst_48 = arith.constant dense<0.000000e+00> : vector<8x128xf32>
    %316 = tpu.matmul %315, %16, %cst_48 {dimension_numbers = #tpu.dot_dimension_numbers<[1], [0], [0], [1], [0, 0, 1, 1], [], []>} : vector<8x64xbf16>, vector<64x128xbf16>, vector<8x128xf32> -> vector<8x128xf32>
    %317 = vector.broadcast %17 : vector<1x128xf32> to vector<8x128xf32>
    %318 = arith.addf %316, %317 : vector<8x128xf32>
    %319 = arith.negf %318 : vector<8x128xf32>
    %320 = math.exp %319 : vector<8x128xf32>
    %cst_49 = arith.constant 1.000000e+00 : f32
    %321 = vector.broadcast %cst_49 : f32 to vector<8x128xf32>
    %322 = arith.addf %321, %320 : vector<8x128xf32>
    %323 = arith.divf %321, %322 : vector<8x128xf32>
    %324 = vector.extract_strided_slice %323 {offsets = [0, 0], sizes = [8, 32], strides = [1, 1]} : vector<8x128xf32> to vector<8x32xf32>
    %325 = vector.extract_strided_slice %323 {offsets = [0, 32], sizes = [8, 32], strides = [1, 1]} : vector<8x128xf32> to vector<8x32xf32>
    %326 = vector.extract_strided_slice %323 {offsets = [0, 96], sizes = [8, 32], strides = [1, 1]} : vector<8x128xf32> to vector<8x32xf32>
    %327 = vector.extract_strided_slice %318 {offsets = [0, 64], sizes = [8, 32], strides = [1, 1]} : vector<8x128xf32> to vector<8x32xf32>
    %328 = math.tanh %327 : vector<8x32xf32>
    %329 = arith.mulf %325, %311 : vector<8x32xf32>
    %330 = arith.mulf %324, %328 : vector<8x32xf32>
    %331 = arith.addf %329, %330 : vector<8x32xf32>
    %332 = math.tanh %331 : vector<8x32xf32>
    %333 = arith.mulf %326, %332 : vector<8x32xf32>
    %334 = tpu.concatenate %293, %333 in 0 : vector<8x32xf32>, vector<8x32xf32> -> vector<16x32xf32>
    %c0_50 = arith.constant 0 : index
    %c0_51 = arith.constant 0 : index
    %335 = vector.load %arg7[%c0_50, %c0_51] : memref<16x32xf32, #tpu.memory_space<vmem>>, vector<16x32xf32>
    tpu.vector_store %arg7[%c0_50, %c0_51], %334 {strides = array<i32>} : memref<16x32xf32, #tpu.memory_space<vmem>>, vector<16x32xf32>,
    %336 = tpu.concatenate %291, %331 in 0 : vector<8x32xf32>, vector<8x32xf32> -> vector<16x32xf32>
    %c0_52 = arith.constant 0 : index
    %c0_53 = arith.constant 0 : index
    %337 = vector.load %arg8[%c0_52, %c0_53] : memref<16x32xf32, #tpu.memory_space<vmem>>, vector<16x32xf32>
    tpu.vector_store %arg8[%c0_52, %c0_53], %336 {strides = array<i32>} : memref<16x32xf32, #tpu.memory_space<vmem>>, vector<16x32xf32>,
    return
  }
}

</mosaic_0001>

<bundles_post_ra>
// kernel: tpu_custom_call.1
= control target key start
LH: loop header
LB: loop body
LE: loop exit
PB: predicated region body
PF: predicated region fallthrough
CT: control target
= control target key end

     0   :  { %14 = vsyncpa [#allocation3], 0  ;;  %v2124_v2 = vmov 0   ;;  %s2609_s0 = inlined_call_operand.vmem [shape: s32[64,1], index: 0, kind: input, shape index: {}]   ;;  %s2610_s1 = inlined_call_operand.vmem [shape: bf16[50,32], index: 1, kind: input, shape index: {}]   ;;  %s2611_s2 = inlined_call_operand.vmem [shape: bf16[32,128], index: 2, kind: input, shape index: {}]   ;;  %s2612_s3 = inlined_call_operand.vmem [shape: bf16[32,128], index: 3, kind: input, shape index: {}]   ;;  %s2613_s4 = inlined_call_operand.vmem [shape: f32[1,128], index: 4, kind: input, shape index: {}]   ;;  %s2614_s5 = inlined_call_operand.vmem [shape: bf16[64,128], index: 5, kind: input, shape index: {}]   ;;  %s2615_s6 = inlined_call_operand.vmem [shape: f32[1,128], index: 6, kind: input, shape index: {}]   ;;  %s2616_s7 = inlined_call_operand.hbm [shape: f32[16,32], index: 7, kind: output, shape index: {0}]   ;;  %s2617_s8 = inlined_call_operand.hbm [shape: f32[16,32], index: 8, kind: output, shape index: {1}]  }
   0x1   :  { %v33_v0 = vld [vmem:[%s2609_s0 + $0x10] sm:$0xff]  ;;  %v31_v1 = vld [vmem:[%s2609_s0] sm:$0xff]  ;;  %1935 = vset.pattern.permute.xlu1 %v2124_v2  ;;  %1934 = vset.pattern.permute.xlu0 %v2124_v2  ;;  %v34_v3 = vld [vmem:[%s2609_s0 + $0x18] sm:$0xff] }
   0x2   :  { %48 = vperm.xlu1 %1935, %v33_v0   ;;  %42 = vperm.xlu0 %1934, %v31_v1   ;;  %v32_v4 = vld [vmem:[%s2609_s0 + $0x8] sm:$0xff]  ;;  %v1936_v5 = vld [vmem:[%s2610_s1] sm:$0xff]   ;;  %v1938_v9 = vld [vmem:[%s2610_s1 + $0x10] sm:$0xff]  }
   0x3   :  { %v1937_v6 = vld [vmem:[%s2610_s1 + $0x8] sm:$0xff]   ;;  %1735 = vmatprep.subr.bf16.mxu0 %v1936_v5  ;;  %v35_v8 = vld [vmem:[%s2609_s0 + $0x20] sm:$0xff]  ;;  %v38_v10 = vld [vmem:[%s2609_s0 + $0x38] sm:$0xff] }
   0x4   :  { %v36_v7 = vld [vmem:[%s2609_s0 + $0x28] sm:$0xff]  ;;  %1736 = vmatpush3.bf16.msra.mxu0 %v1936_v5  ;;  %v37_v11 = vld [vmem:[%s2609_s0 + $0x30] sm:$0xff]  ;;  %v1939_v12 = vld [vmem:[%s2610_s1 + $0x18] ss:$0 sps:$4 sm:$0x11]  }
   0x5   :  { %1737 = vmatprep.subr.bf16.mxu0 %v1937_v6 }
   0x6   :  { %51 = vperm.xlu1 %1935, %v34_v3   ;;  %45 = vperm.xlu0 %1934, %v32_v4  }
   0x8   :  { %1738 = vmatpush3.bf16.msra.mxu0 %v1937_v6 }
   0x9   :  { %1739 = vmatprep.subr.bf16.mxu0 %v1938_v9 }
   0xa   :  { %57 = vperm.xlu1 %1935, %v36_v7   ;;  %54 = vperm.xlu0 %1934, %v35_v8  }
   0xb   :  { %15 = vsyncpa [#allocation5], 0  ;;  %vm134_vm0 = vcmask 1040384   ;;  %v1940_v14 = vld [vmem:[%s2611_s2] sm:$0xff]   ;;  %v2125_v15 = vmov 0.0   ;;  %v39_v16 = vlaneseq  ;;  %vm121_vm5 = vcmask 408576  }
   0xc   :  { %1740 = vmatpush3.bf16.msra.mxu0 %v1938_v9  ;;  %v136_v13 = vsel %vm134_vm0, %v1939_v12, 0  ;;  %1751 = vmatprep.subr.bf16.mxu1 %v1940_v14  ;;  %v1941_v38 = vld [vmem:[%s2611_s2 + $0x8] sm:$0xff]   ;;  %v2240_v39 = vld [vmem:[%s2612_s3] sm:$0xff]   ;;  %vm2126_vm10 = vmmov 0   ;;  %vm230_vm11 = vcmask 261120   ;;  %s2128_s13 = smov 32  }
   0xd   :  { %1923 = vmatprep.subr.msk.bf16.mxu0 %vm134_vm0, %v1939_v12  ;;  %1752 = vmatpush3.bf16.msra.mxu1 %v1940_v14  ;;  %v40_v17 = vand.u32 127, %v39_v16  ;;  %v2247_v40 = vld [vmem:[%s2612_s3 + $0x8] sm:$0xff]   ;;  %v1612_v53 = vld [vmem:[%s2613_s4] ss:$0 sm:$0xff]  ;;  %s2127_s4 = smov 64   ;;  %vm509_vm12 = vcmask 523264  }
   0xe   :  { %63 = vperm.xlu1 %1935, %v38_v10   ;;  %60 = vperm.xlu0 %1934, %v37_v11   ;;  %s2130_s23 = smov [#allocation2]   ;;  %s2131_s25 = smov [#allocation4]  }
   0xf   :  { %1753 = vmatprep.subr.bf16.mxu1 %v1941_v38  ;;  %s1569_s24 = sshll.u32 %s2130_s23, 4  ;;  %s1581_s26 = sshll.u32 %s2131_s25, 4  ;;  %s1570_s24 = int_to_ptr.vmem [resolvable:$true] %s1569_s24  ;;  %s1582_s26 = int_to_ptr.vmem [resolvable:$true] %s1581_s26 }
  0x10   :  { %1742 = vmatpush3.bf16.msra.mxu0 %v136_v13  ;;  %s2076_s27 = scalar_lea.vmem %s1570_s24, 256  ;;  %p2081_p1 = scmp.lt.s32.totalorder %s1570_s24, %s1570_s24 }
  0x11   :  { %1771 = vmatprep.subr.bf16.mxu0 %v2125_v15  ;;  %1754 = vmatpush3.bf16.msra.mxu1 %v1941_v38  ;;  %p2077_p0 = scmp.ne.s32.totalorder %s1570_s24, %s2076_s27  ;;  %p2082_p2 = scmp.lt.s32.totalorder %s2076_s27, %s2076_s27 }
  0x12   :  { %1763 = vmatprep.subr.bf16.mxu1 %v2125_v15 }
  0x13   :  { %p2083_p3 = por %p2082_p2, %p2081_p1 }
  0x15   :  { %p2084_p4 = pnand %p2083_p3, %p2077_p0 }
  0x81   :  { %v49_v18 = vpop.permute.xlu1 %48  ;;  %v43_v19 = vpop.permute.xlu0 %42 }
  0x82   :  { %vm67_vm1 = vcmp.eq.s32.totalorder %v40_v17, %v49_v18  ;;  %vm65_vm2 = vcmp.eq.s32.totalorder %v40_v17, %v43_v19 }
  0x83   :  { %v1598_v22 = vsel %vm67_vm1, 1.0, %v2125_v15  ;;  %v1596_v23 = vsel %vm65_vm2, 1.0, %v2125_v15 }
  0x85   :  { %v52_v20 = vpop.permute.xlu1 %51  ;;  %v46_v21 = vpop.permute.xlu0 %45 }
  0x86   :  { %vm68_vm3 = vcmp.eq.s32.totalorder %v40_v17, %v52_v20  ;;  %vm66_vm4 = vcmp.eq.s32.totalorder %v40_v17, %v46_v21 }
  0x87   :  { %v1599_v24 = vsel %vm68_vm3, 1.0, %v2125_v15  ;;  %v1597_v25 = vsel %vm66_vm4, 1.0, %v2125_v15 }
  0x88   :  { %v90_v26 = vpack.c.bf16 %v1599_v24, %v1598_v22  ;;  %v89_v27 = vpack.c.bf16 %v1597_v25, %v1596_v23  ;;  %v2291_v22 = vld [vmem:[%s2614_s5] sm:$0xff]   ;;  %v2297_v23 = vld [vmem:[%s2614_s5 + $0x8] sm:$0xff]   ;;  %v2304_v24 = vld [vmem:[%s2614_s5 + $0x10] sm:$0xff]  }
  0x89   :  { %v58_v28 = vpop.permute.xlu1 %57  ;;  %v55_v29 = vpop.permute.xlu0 %54 }
  0x8a   :  { %vm70_vm6 = vcmp.eq.s32.totalorder %v40_v17, %v58_v28  ;;  %vm69_vm7 = vcmp.eq.s32.totalorder %v40_v17, %v55_v29  ;;  %1743 = vmatprep.mubr.msk.bf16.mxu0 %vm121_vm5, %v89_v27 }
  0x8b   :  { %v1601_v30 = vsel %vm70_vm6, 1.0, %v2125_v15  ;;  %v1600_v31 = vsel %vm69_vm7, 1.0, %v2125_v15  ;;  %1744 = vmatmul.mubr.msk.bf16.vlgmr.msra.gmra.mrb[0].mxu0 %vm121_vm5, %v90_v26  ;;  %v2313_v26 = vld [vmem:[%s2614_s5 + $0x18] sm:$0xff]  }
  0x8c   :  { %v91_v32 = vpack.c.bf16 %v1601_v30, %v1600_v31  ;;  %1772 = vmatpush3.bf16.msra.mxu0 %v2240_v39 }
  0x8d   :  { %v64_v33 = vpop.permute.xlu1 %63  ;;  %v61_v34 = vpop.permute.xlu0 %60  ;;  %1773 = vmatprep.subr.bf16.mxu0 %v2125_v15 }
  0x8e   :  { %vm72_vm8 = vcmp.eq.s32.totalorder %v40_v17, %v64_v33  ;;  %vm71_vm9 = vcmp.eq.s32.totalorder %v40_v17, %v61_v34  ;;  %1747 = vmatprep.mubr.msk.bf16.mxu0 %vm121_vm5, %v91_v32  ;;  %v2337_v34 = vld [vmem:[%s2615_s6] ss:$0 sm:$0xff]  ;;  %s2129_s6 = smov 96  }
  0x8f   :  { %v1603_v35 = vsel %vm72_vm8, 1.0, %v2125_v15  ;;  %v1602_v36 = vsel %vm71_vm9, 1.0, %v2125_v15 }
  0x90   :  { %v92_v37 = vpack.c.bf16 %v1603_v35, %v1602_v36  ;;  %1774 = vmatpush3.bf16.msra.mxu0 %v2247_v40 }
  0x91   :  { %1791 = vmatprep.subr.bf16.mxu0 %v2125_v15 }
  0x93   :  { %1748 = vmatmul.mubr.msk.bf16.gmra.mrb[4].mxu0 %vm121_vm5, %v92_v37 }
  0x94   :  { %1775 = vmatprep.mubr.msk.bf16.mxu0 %vm2126_vm10, %v2125_v15 }
 0x15e   :  { %v1745_v41 = vpop.f32.mrb[0].mxu0 }
 0x15f   :  { %v172_v42 = vpop.f32.mrb[1].mxu0 }
 0x160   :  { %v1746_v43 = vpop.f32.mrb[2].mxu0 }
 0x161   :  { %v209_v44 = vpack.c.bf16 %v1746_v43, %v1745_v41  ;;  %v175_v45 = vpop.f32.mrb[3].mxu0 }
 0x162   :  { %v208_v46 = vpack.c.bf16 %v175_v45, %v172_v42 }
 0x164   :  { %1755 = vmatprep.mubr.msk.bf16.mxu1 %vm230_vm11, %v208_v46 }
 0x165   :  { %1756 = vmatmul.mubr.msk.bf16.vlgmr.msra.gmra.mrb[0].mxu1 %vm230_vm11, %v209_v44 }
 0x166   :  { %1764 = vmatpush3.bf16.msra.mxu1 %v2240_v39  ;;  %v1749_v47 = vpop.f32.mrb[4].mxu0 }
 0x167   :  { %v188_v48 = vpop.f32.mrb[5].mxu0  ;;  %1765 = vmatprep.subr.bf16.mxu1 %v2125_v15 }
 0x168   :  { %v1750_v49 = vpop.f32.mrb[6].mxu0 }
 0x169   :  { %v211_v50 = vpack.c.bf16 %v1750_v49, %v1749_v47  ;;  %v191_v51 = vpop.f32.mrb[7].mxu0 }
 0x16a   :  { %v210_v52 = vpack.c.bf16 %v191_v51, %v188_v48  ;;  %1766 = vmatpush3.bf16.msra.mxu1 %v2247_v40 }
 0x16b   :  { %1779 = vmatprep.subr.bf16.mxu1 %v2125_v15 }
 0x16c   :  { %1759 = vmatprep.mubr.msk.bf16.mxu1 %vm230_vm11, %v210_v52 }
 0x16d   :  { %1760 = vmatmul.mubr.msk.bf16.gmra.mrb[4].mxu1 %vm230_vm11, %v211_v50 }
 0x16e   :  { %1767 = vmatprep.mubr.msk.bf16.mxu1 %vm2126_vm10, %v2125_v15 }
 0x175   :  { %1768 = vmatmul.mubr.bf16.vlgmr.msra.gmra.mrb[8].mxu1 %v2124_v2 }
 0x176   :  { %1787 = vmatprep.mubr.msk.bf16.mxu1 %vm2126_vm10, %v2125_v15  ;;  %1780 = vmatpush3.bf16.msra.mxu1 %v2291_v22 }
 0x177   :  { %1781 = vmatprep.subr.bf16.mxu1 %v2125_v15 }
 0x17a   :  { %1782 = vmatpush3.bf16.msra.mxu1 %v2297_v23 }
 0x17b   :  { %1783 = vmatprep.subr.bf16.mxu1 %v2125_v15 }
 0x17e   :  { %1784 = vmatpush3.bf16.msra.mxu1 %v2304_v24 }
 0x17f   :  { %1785 = vmatprep.subr.bf16.mxu1 %v2125_v15 }
 0x182   :  { %1786 = vmatpush3.bf16.msra.mxu1 %v2313_v26 }
 0x183   :  { %1811 = vmatprep.subr.bf16.mxu1 %v2125_v15 }
 0x238   :  { %v1757_v54 = vpop.f32.mrb[0].mxu1 }
 0x239   :  { %v2269_v55 = vadd.f32 %v1757_v54, %v1612_v53  ;;  %v277_v56 = vpop.f32.mrb[1].mxu1 }
 0x23a   :  { %v1758_v57 = vpop.f32.mrb[2].mxu1  ;;  %v278_v5 = vadd.f32 %v1612_v53, %v277_v56 }
 0x23b   :  { %v2271_v58 = vadd.f32 %v1758_v57, %v1612_v53  ;;  %v280_v59 = vpop.f32.mrb[3].mxu1 }
 0x23c   :  { %v2273_v60 = vadd.f32 %v1612_v53, %v280_v59 }
 0x240   :  { %v1761_v61 = vpop.f32.mrb[4].mxu1 }
 0x241   :  { %v2275_v62 = vadd.f32 %v1761_v61, %v1612_v53  ;;  %v293_v63 = vpop.f32.mrb[5].mxu1 }
 0x242   :  { %v2277_v0 = vadd.f32 %v1612_v53, %v293_v63  ;;  %v1762_v1 = vpop.f32.mrb[6].mxu1 }
 0x243   :  { %v2279_v2 = vadd.f32 %v1762_v1, %v1612_v53  ;;  %v296_v3 = vpop.f32.mrb[7].mxu1 }
 0x244   :  { %v2281_v4 = vadd.f32 %v1612_v53, %v296_v3 }
 0x248   :  { %v370_v6 = vpop.f32.mrb[8].mxu1 }
 0x249   :  { %v376_v7 = vadd.f32 %v370_v6, %v278_v5  ;;  %v1769_v8 = vpop.f32.mrb[9].mxu1 }
 0x24a   :  { %v373_v9 = vpop.f32.mrb[10].mxu1 }
 0x24b   :  { %1948 = vtanh.f32 %v376_v7  ;;  %v1770_v10 = vpop.f32.mrb[11].mxu1  ;;  %v1621_v12 = vmul.f32 -1.442695, %v376_v7 }
 0x24d   :  { %1950 = vpow2.f32 %v1621_v12 }
 0x255   :  { %v1949_v11 = vpop.eup %1948 }
 0x256   :  { %386 = vrot.lane.b32.xlu0 %v1949_v11, %s2127_s4 }
 0x257   :  { %v1951_v13 = vpop.eup %1950 }
 0x258   :  { %v380_v14 = vadd.f32 1.0, %v1951_v13 }
 0x25a   :  { %1952 = vrcp.f32 %v380_v14 }
 0x264   :  { %v1953_v16 = vpop.eup %1952 }
 0x265   :  { %v384_v19 = vmul.f32 0.0, %v1953_v16 }
 0x2c8   :  { %v387_v17 = vpop.permute.xlu0 %386 }
 0x2c9   :  { %v389_v18 = vmul.f32 %v1953_v16, %v387_v17 }
 0x2cb   :  { %391 = vrot.lane.b32.xlu1 %v389_v18, %s2128_s13 }
 0x33d   :  { %v392_v20 = vpop.permute.xlu1 %391 }
 0x33e   :  { %v2285_v21 = vadd.f32 %v392_v20, %v384_v19 }
 0x340   :  { %1954 = vtanh.f32 %v2285_v21 }
 0x34a   :  { %v1955_v25 = vpop.eup %1954 }
 0x34b   :  { %397 = vrot.lane.b32.xlu0 %v1955_v25, %s2127_s4 }
 0x3bd   :  { %v398_v27 = vpop.permute.xlu0 %397 }
 0x3be   :  { %v400_v28 = vmul.f32 %v1953_v16, %v398_v27 }
 0x3c0   :  { %v401_v29 = vpack.c.bf16 %v400_v28, %v400_v28  ;;  %474 = vrot.lane.b32.xlu0 %v400_v28, %s2128_s13 }
 0x3c2   :  { %403 = vrot.lane.b32.xlu1 %v401_v29, %s2128_s13 }
 0x432   :  { %v475_v30 = vpop.permute.xlu0 %474 }
 0x433   :  { %v477_v31 = vsel %vm230_vm11, %v475_v30, 0.0 }
 0x434   :  { %v478_v32 = vpack.c.bf16 %v477_v31, %v477_v31  ;;  %v404_v33 = vpop.permute.xlu1 %403 }
 0x435   :  { %1776 = vmatmul.mubr.msk.bf16.vlgmr.msra.gmra.mrb[8].mxu0 %vm230_vm11, %v404_v33 }
 0x436   :  { %1788 = vmatmul.mubr.msk.bf16.vlgmr.msra.gmra.mrb[12].mxu1 %vm509_vm12, %v478_v32  ;;  %1792 = vmatpush3.bf16.msra.mxu0 %v2240_v39 }
 0x437   :  { %1793 = vmatprep.subr.bf16.mxu0 %v2125_v15  ;;  %1795 = vmatprep.mubr.msk.bf16.mxu0 %vm2126_vm10, %v2125_v15 }
 0x438   :  { %1812 = vmatpush3.bf16.msra.mxu1 %v2240_v39  ;;  %1815 = vmatprep.mubr.msk.bf16.mxu1 %vm2126_vm10, %v2125_v15 }
 0x439   :  { %1813 = vmatprep.subr.bf16.mxu1 %v2125_v15 }
 0x43a   :  { %1794 = vmatpush3.bf16.msra.mxu0 %v2247_v40 }
 0x43b   :  { %1799 = vmatprep.subr.bf16.mxu0 %v2125_v15 }
 0x43c   :  { %1814 = vmatpush3.bf16.msra.mxu1 %v2247_v40 }
 0x43d   :  { %1819 = vmatprep.subr.bf16.mxu1 %v2125_v15 }
 0x508   :  { %v442_v35 = vpop.f32.mrb[8].mxu0 }
 0x509   :  { %v448_v36 = vadd.f32 %v442_v35, %v2273_v60  ;;  %v1777_v37 = vpop.f32.mrb[9].mxu0  ;;  %v547_v38 = vpop.f32.mrb[12].mxu1 }
 0x50a   :  { %v548_v41 = vadd.f32 %v2337_v34, %v547_v38  ;;  %v445_v42 = vpop.f32.mrb[10].mxu0  ;;  %v1789_v43 = vpop.f32.mrb[13].mxu1 }
 0x50b   :  { %1956 = vtanh.f32 %v448_v36  ;;  %v1778_v44 = vpop.f32.mrb[11].mxu0  ;;  %v550_v45 = vpop.f32.mrb[14].mxu1  ;;  %v1623_v49 = vmul.f32 -1.442695, %v448_v36 }
 0x50c   :  { %1958 = vtanh.f32 %v548_v41  ;;  %v1790_v46 = vpop.f32.mrb[15].mxu1  ;;  %v1630_v50 = vmul.f32 -1.442695, %v548_v41 }
 0x50d   :  { %1960 = vpow2.f32 %v1623_v49 }
 0x50e   :  { %1962 = vpow2.f32 %v1630_v50 }
 0x515   :  { %v1957_v47 = vpop.eup %1956 }
 0x516   :  { %v1959_v48 = vpop.eup %1958  ;;  %458 = vrot.lane.b32.xlu1 %v1957_v47, %s2127_s4 }
 0x517   :  { %562 = vrot.lane.b32.xlu0 %v1959_v48, %s2127_s4  ;;  %v1961_v51 = vpop.eup %1960 }
 0x518   :  { %v1963_v52 = vpop.eup %1962  ;;  %v452_v53 = vadd.f32 1.0, %v1961_v51 }
 0x519   :  { %v556_v54 = vadd.f32 1.0, %v1963_v52 }
 0x51a   :  { %1964 = vrcp.f32 %v452_v53 }
 0x51b   :  { %1966 = vrcp.f32 %v556_v54 }
 0x524   :  { %v1965_v56 = vpop.eup %1964 }
 0x525   :  { %v1967_v59 = vpop.eup %1966  ;;  %v456_v1 = vmul.f32 %v1965_v56, %v2285_v21 }
 0x526   :  { %v560_v5 = vmul.f32 0.0, %v1967_v59 }
 0x588   :  { %v459_v57 = vpop.permute.xlu1 %458 }
 0x589   :  { %v461_v60 = vmul.f32 %v1965_v56, %v459_v57  ;;  %v563_v61 = vpop.permute.xlu0 %562 }
 0x58a   :  { %v565_v63 = vmul.f32 %v1967_v59, %v563_v61 }
 0x58b   :  { %463 = vrot.lane.b32.xlu1 %v461_v60, %s2128_s13 }
 0x58c   :  { %567 = vrot.lane.b32.xlu0 %v565_v63, %s2128_s13 }
 0x5fd   :  { %v464_v3 = vpop.permute.xlu1 %463 }
 0x5fe   :  { %v2346_v6 = vadd.f32 %v464_v3, %v456_v1  ;;  %v568_v7 = vpop.permute.xlu0 %567 }
 0x5ff   :  { %v2348_v8 = vadd.f32 %v568_v7, %v560_v5 }
 0x600   :  { %1968 = vtanh.f32 %v2346_v6 }
 0x601   :  { %1970 = vtanh.f32 %v2348_v8 }
 0x60a   :  { %v1969_v9 = vpop.eup %1968 }
 0x60b   :  { %v1971_v10 = vpop.eup %1970  ;;  %469 = vrot.lane.b32.xlu1 %v1969_v9, %s2127_s4 }
 0x60c   :  { %573 = vrot.lane.b32.xlu0 %v1971_v10, %s2127_s4 }
 0x67d   :  { %v470_v11 = vpop.permute.xlu1 %469 }
 0x67e   :  { %v472_v12 = vmul.f32 %v1965_v56, %v470_v11  ;;  %v574_v14 = vpop.permute.xlu0 %573 }
 0x67f   :  { %v576_v16 = vmul.f32 %v1967_v59, %v574_v14 }
 0x680   :  { %v577_v13 = vpack.c.bf16 %v472_v12, %v472_v12  ;;  %650 = vrot.lane.b32.xlu0 %v472_v12, %s2128_s13 }
 0x682   :  { %579 = vrot.lane.b32.xlu1 %v577_v13, %s2128_s13 }
 0x686   :  { %654 = vrot.lane.b32.xlu1 %v576_v16, %s2127_s4 }
 0x6f2   :  { %v651_v19 = vpop.permute.xlu0 %650 }
 0x6f4   :  { %v580_v17 = vpop.permute.xlu1 %579 }
 0x6f5   :  { %1796 = vmatmul.mubr.msk.bf16.vlgmr.msra.gmra.mrb[12].mxu0 %vm230_vm11, %v580_v17 }
 0x6f6   :  { %1800 = vmatpush3.bf16.msra.mxu0 %v2291_v22  ;;  %1807 = vmatprep.mubr.msk.bf16.mxu0 %vm2126_vm10, %v2125_v15 }
 0x6f7   :  { %1801 = vmatprep.subr.bf16.mxu0 %v2125_v15 }
 0x6f8   :  { %v655_v18 = vpop.permute.xlu1 %654 }
 0x6f9   :  { %v657_v20 = vsel %vm230_vm11, %v651_v19, %v655_v18 }
 0x6fa   :  { %1802 = vmatpush3.bf16.msra.mxu0 %v2297_v23  ;;  %v658_v21 = vpack.c.bf16 %v657_v20, %v657_v20 }
 0x6fb   :  { %1803 = vmatprep.subr.bf16.mxu0 %v2125_v15 }
 0x6fe   :  { %1804 = vmatpush3.bf16.msra.mxu0 %v2304_v24 }
 0x6ff   :  { %1805 = vmatprep.subr.bf16.mxu0 %v2125_v15 }
 0x702   :  { %1806 = vmatpush3.bf16.msra.mxu0 %v2313_v26 }
 0x703   :  { %1831 = vmatprep.subr.bf16.mxu0 %v2125_v15 }
 0x705   :  { %1808 = vmatmul.mubr.msk.bf16.vlgmr.msra.gmra.mrb[16].mxu0 %vm509_vm12, %v658_v21 }
 0x706   :  { %1832 = vmatpush3.bf16.msra.mxu0 %v2240_v39  ;;  %1835 = vmatprep.mubr.msk.bf16.mxu0 %vm2126_vm10, %v2125_v15 }
 0x707   :  { %1833 = vmatprep.subr.bf16.mxu0 %v2125_v15 }
 0x70a   :  { %1834 = vmatpush3.bf16.msra.mxu0 %v2247_v40 }
 0x70b   :  { %1839 = vmatprep.subr.bf16.mxu0 %v2125_v15 }
 0x7c8   :  { %v618_v25 = vpop.f32.mrb[12].mxu0 }
 0x7c9   :  { %v624_v27 = vadd.f32 %v618_v25, %v2269_v55  ;;  %v1797_v28 = vpop.f32.mrb[13].mxu0 }
 0x7ca   :  { %v621_v29 = vpop.f32.mrb[14].mxu0 }
 0x7cb   :  { %1972 = vtanh.f32 %v624_v27  ;;  %v1798_v30 = vpop.f32.mrb[15].mxu0  ;;  %v1632_v41 = vmul.f32 -1.442695, %v624_v27 }
 0x7d5   :  { %v1973_v31 = vpop.eup %1972 }
 0x7d6   :  { %634 = vrot.lane.b32.xlu0 %v1973_v31, %s2127_s4 }
 0x7d8   :  { %v696_v32 = vpop.f32.mrb[16].mxu0 }
 0x7d9   :  { %v697_v33 = vadd.f32 %v2337_v34, %v696_v32  ;;  %v1809_v35 = vpop.f32.mrb[17].mxu0 }
 0x7da   :  { %v699_v36 = vpop.f32.mrb[18].mxu0 }
 0x7db   :  { %1974 = vtanh.f32 %v697_v33  ;;  %v1810_v37 = vpop.f32.mrb[19].mxu0  ;;  %v1634_v42 = vmul.f32 -1.442695, %v697_v33 }
 0x7dc   :  { %1976 = vpow2.f32 %v1632_v41 }
 0x7dd   :  { %1978 = vpow2.f32 %v1634_v42 }
 0x7e5   :  { %v1975_v38 = vpop.eup %1974 }
 0x7e6   :  { %711 = vrot.lane.b32.xlu1 %v1975_v38, %s2127_s4  ;;  %v1977_v55 = vpop.eup %1976 }
 0x7e7   :  { %v628_v43 = vadd.f32 1.0, %v1977_v55  ;;  %v1979_v44 = vpop.eup %1978 }
 0x7e8   :  { %v705_v48 = vadd.f32 1.0, %v1979_v44 }
 0x7e9   :  { %1980 = vrcp.f32 %v628_v43 }
 0x7ea   :  { %1982 = vrcp.f32 %v705_v48 }
 0x7f3   :  { %v1981_v45 = vpop.eup %1980 }
 0x7f4   :  { %v1983_v49 = vpop.eup %1982  ;;  %v632_v52 = vmul.f32 %v1981_v45, %v2346_v6 }
 0x7f5   :  { %v709_v57 = vmul.f32 %v1983_v49, %v2348_v8 }
 0x848   :  { %v635_v46 = vpop.permute.xlu0 %634 }
 0x849   :  { %v637_v47 = vmul.f32 %v1981_v45, %v635_v46 }
 0x84b   :  { %639 = vrot.lane.b32.xlu0 %v637_v47, %s2128_s13 }
 0x858   :  { %v712_v50 = vpop.permute.xlu1 %711 }
 0x859   :  { %v714_v51 = vmul.f32 %v1983_v49, %v712_v50 }
 0x85b   :  { %716 = vrot.lane.b32.xlu1 %v714_v51, %s2128_s13 }
 0x8bd   :  { %v640_v53 = vpop.permute.xlu0 %639 }
 0x8be   :  { %v2383_v54 = vadd.f32 %v640_v53, %v632_v52 }
 0x8c0   :  { %1984 = vtanh.f32 %v2383_v54 }
 0x8ca   :  { %v1985_v56 = vpop.eup %1984 }
 0x8cb   :  { %645 = vrot.lane.b32.xlu0 %v1985_v56, %s2127_s4 }
 0x8cd   :  { %v717_v59 = vpop.permute.xlu1 %716 }
 0x8ce   :  { %v2388_v60 = vadd.f32 %v717_v59, %v709_v57 }
 0x8d0   :  { %1986 = vtanh.f32 %v2388_v60 }
 0x8da   :  { %v1987_v61 = vpop.eup %1986 }
 0x8db   :  { %722 = vrot.lane.b32.xlu1 %v1987_v61, %s2127_s4 }
 0x93d   :  { %v646_v63 = vpop.permute.xlu0 %645 }
 0x93e   :  { %v648_v1 = vmul.f32 %v1981_v45, %v646_v63 }
 0x940   :  { %v726_v3 = vpack.c.bf16 %v648_v1, %v648_v1  ;;  %799 = vrot.lane.b32.xlu1 %v648_v1, %s2128_s13 }
 0x942   :  { %728 = vrot.lane.b32.xlu0 %v726_v3, %s2128_s13 }
 0x94d   :  { %v723_v5 = vpop.permute.xlu1 %722 }
 0x94e   :  { %v725_v6 = vmul.f32 %v1983_v49, %v723_v5 }
 0x950   :  { %803 = vrot.lane.b32.xlu0 %v725_v6, %s2127_s4 }
 0x9b2   :  { %v800_v8 = vpop.permute.xlu1 %799 }
 0x9b4   :  { %v729_v7 = vpop.permute.xlu0 %728 }
 0x9b5   :  { %1816 = vmatmul.mubr.msk.bf16.vlgmr.msra.gmra.mrb[16].mxu1 %vm230_vm11, %v729_v7 }
 0x9b6   :  { %1820 = vmatpush3.bf16.msra.mxu1 %v2291_v22  ;;  %1827 = vmatprep.mubr.msk.bf16.mxu1 %vm2126_vm10, %v2125_v15 }
 0x9b7   :  { %1821 = vmatprep.subr.bf16.mxu1 %v2125_v15 }
 0x9ba   :  { %1822 = vmatpush3.bf16.msra.mxu1 %v2297_v23 }
 0x9bb   :  { %1823 = vmatprep.subr.bf16.mxu1 %v2125_v15 }
 0x9be   :  { %1824 = vmatpush3.bf16.msra.mxu1 %v2304_v24 }
 0x9bf   :  { %1825 = vmatprep.subr.bf16.mxu1 %v2125_v15 }
 0x9c2   :  { %v804_v9 = vpop.permute.xlu0 %803  ;;  %1826 = vmatpush3.bf16.msra.mxu1 %v2313_v26 }
 0x9c3   :  { %v806_v10 = vsel %vm230_vm11, %v800_v8, %v804_v9  ;;  %1851 = vmatprep.subr.bf16.mxu1 %v2125_v15 }
 0x9c4   :  { %v807_v11 = vpack.c.bf16 %v806_v10, %v806_v10 }
 0x9c6   :  { %1828 = vmatmul.mubr.msk.bf16.vlgmr.msra.gmra.mrb[20].mxu1 %vm509_vm12, %v807_v11 }
 0x9c7   :  { %1852 = vmatpush3.bf16.msra.mxu1 %v2240_v39  ;;  %1855 = vmatprep.mubr.msk.bf16.mxu1 %vm2126_vm10, %v2125_v15 }
 0x9c8   :  { %1853 = vmatprep.subr.bf16.mxu1 %v2125_v15 }
 0x9cb   :  { %1854 = vmatpush3.bf16.msra.mxu1 %v2247_v40 }
 0x9cc   :  { %1859 = vmatprep.subr.bf16.mxu1 %v2125_v15 }
 0xa88   :  { %v767_v12 = vpop.f32.mrb[16].mxu1 }
 0xa89   :  { %v773_v13 = vadd.f32 %v767_v12, %v2271_v58  ;;  %v1817_v14 = vpop.f32.mrb[17].mxu1 }
 0xa8a   :  { %v770_v16 = vpop.f32.mrb[18].mxu1 }
 0xa8b   :  { %1988 = vtanh.f32 %v773_v13  ;;  %v1818_v17 = vpop.f32.mrb[19].mxu1  ;;  %v1636_v29 = vmul.f32 -1.442695, %v773_v13 }
 0xa95   :  { %v1989_v18 = vpop.eup %1988 }
 0xa96   :  { %783 = vrot.lane.b32.xlu1 %v1989_v18, %s2127_s4 }
 0xa99   :  { %v845_v19 = vpop.f32.mrb[20].mxu1 }
 0xa9a   :  { %v846_v20 = vadd.f32 %v2337_v34, %v845_v19  ;;  %v1829_v21 = vpop.f32.mrb[21].mxu1 }
 0xa9b   :  { %v848_v25 = vpop.f32.mrb[22].mxu1 }
 0xa9c   :  { %1990 = vtanh.f32 %v846_v20  ;;  %v1830_v27 = vpop.f32.mrb[23].mxu1  ;;  %v1638_v31 = vmul.f32 -1.442695, %v846_v20 }
 0xa9d   :  { %1992 = vpow2.f32 %v1636_v29 }
 0xaa6   :  { %v1991_v28 = vpop.eup %1990 }
 0xaa7   :  { %860 = vrot.lane.b32.xlu0 %v1991_v28, %s2127_s4  ;;  %v1993_v58 = vpop.eup %1992 }
 0xaa8   :  { %v777_v30 = vadd.f32 1.0, %v1993_v58 }
 0xaaa   :  { %1994 = vrcp.f32 %v777_v30 }
 0xaab   :  { %1996 = vpow2.f32 %v1638_v31 }
 0xab4   :  { %v1995_v32 = vpop.eup %1994 }
 0xab5   :  { %v1997_v33 = vpop.eup %1996  ;;  %v781_v42 = vmul.f32 %v1995_v32, %v2383_v54 }
 0xab6   :  { %v854_v37 = vadd.f32 1.0, %v1997_v33 }
 0xab8   :  { %1998 = vrcp.f32 %v854_v37 }
 0xac2   :  { %v1999_v38 = vpop.eup %1998 }
 0xac3   :  { %v858_v46 = vmul.f32 %v1999_v38, %v2388_v60 }
 0xb08   :  { %v784_v35 = vpop.permute.xlu1 %783 }
 0xb09   :  { %v786_v36 = vmul.f32 %v1995_v32, %v784_v35 }
 0xb0b   :  { %788 = vrot.lane.b32.xlu1 %v786_v36, %s2128_s13 }
 0xb19   :  { %v861_v41 = vpop.permute.xlu0 %860 }
 0xb1a   :  { %v863_v55 = vmul.f32 %v1999_v38, %v861_v41 }
 0xb1c   :  { %865 = vrot.lane.b32.xlu0 %v863_v55, %s2128_s13 }
 0xb7d   :  { %v789_v43 = vpop.permute.xlu1 %788 }
 0xb7e   :  { %v2421_v44 = vadd.f32 %v789_v43, %v781_v42 }
 0xb80   :  { %2000 = vtanh.f32 %v2421_v44 }
 0xb8a   :  { %v2001_v45 = vpop.eup %2000 }
 0xb8b   :  { %794 = vrot.lane.b32.xlu1 %v2001_v45, %s2127_s4 }
 0xb8e   :  { %v866_v47 = vpop.permute.xlu0 %865 }
 0xb8f   :  { %v2426_v48 = vadd.f32 %v866_v47, %v858_v46 }
 0xb91   :  { %2002 = vtanh.f32 %v2426_v48 }
 0xb9b   :  { %v2003_v49 = vpop.eup %2002 }
 0xb9c   :  { %871 = vrot.lane.b32.xlu0 %v2003_v49, %s2127_s4 }
 0xbfd   :  { %v795_v50 = vpop.permute.xlu1 %794 }
 0xbfe   :  { %v797_v51 = vmul.f32 %v1995_v32, %v795_v50 }
 0xc00   :  { %v875_v52 = vpack.c.bf16 %v797_v51, %v797_v51  ;;  %948 = vrot.lane.b32.xlu0 %v797_v51, %s2128_s13 }
 0xc02   :  { %877 = vrot.lane.b32.xlu1 %v875_v52, %s2128_s13 }
 0xc0e   :  { %v872_v53 = vpop.permute.xlu0 %871 }
 0xc0f   :  { %v874_v54 = vmul.f32 %v1999_v38, %v872_v53 }
 0xc11   :  { %952 = vrot.lane.b32.xlu1 %v874_v54, %s2127_s4 }
 0xc72   :  { %v949_v57 = vpop.permute.xlu0 %948 }
 0xc74   :  { %v878_v56 = vpop.permute.xlu1 %877 }
 0xc75   :  { %1836 = vmatmul.mubr.msk.bf16.vlgmr.msra.gmra.mrb[20].mxu0 %vm230_vm11, %v878_v56 }
 0xc76   :  { %1840 = vmatpush3.bf16.msra.mxu0 %v2291_v22  ;;  %1847 = vmatprep.mubr.msk.bf16.mxu0 %vm2126_vm10, %v2125_v15 }
 0xc77   :  { %1841 = vmatprep.subr.bf16.mxu0 %v2125_v15 }
 0xc7a   :  { %1842 = vmatpush3.bf16.msra.mxu0 %v2297_v23 }
 0xc7b   :  { %1843 = vmatprep.subr.bf16.mxu0 %v2125_v15 }
 0xc7e   :  { %1844 = vmatpush3.bf16.msra.mxu0 %v2304_v24 }
 0xc7f   :  { %1845 = vmatprep.subr.bf16.mxu0 %v2125_v15 }
 0xc82   :  { %1846 = vmatpush3.bf16.msra.mxu0 %v2313_v26 }
 0xc83   :  { %v953_v59 = vpop.permute.xlu1 %952  ;;  %1871 = vmatprep.subr.bf16.mxu0 %v2125_v15 }
 0xc84   :  { %v955_v60 = vsel %vm230_vm11, %v949_v57, %v953_v59 }
 0xc85   :  { %v956_v61 = vpack.c.bf16 %v955_v60, %v955_v60 }
 0xc87   :  { %1848 = vmatmul.mubr.msk.bf16.vlgmr.msra.gmra.mrb[24].mxu0 %vm509_vm12, %v956_v61 }
 0xc88   :  { %1872 = vmatpush3.bf16.msra.mxu0 %v2240_v39  ;;  %1875 = vmatprep.mubr.msk.bf16.mxu0 %vm2126_vm10, %v2125_v15 }
 0xc89   :  { %1873 = vmatprep.subr.bf16.mxu0 %v2125_v15 }
 0xc8c   :  { %1874 = vmatpush3.bf16.msra.mxu0 %v2247_v40 }
 0xc8d   :  { %1879 = vmatprep.subr.bf16.mxu0 %v2125_v15 }
 0xd48   :  { %v916_v63 = vpop.f32.mrb[20].mxu0 }
 0xd49   :  { %v922_v1 = vadd.f32 %v916_v63, %v2277_v0  ;;  %v1837_v3 = vpop.f32.mrb[21].mxu0 }
 0xd4a   :  { %v919_v5 = vpop.f32.mrb[22].mxu0 }
 0xd4b   :  { %2004 = vtanh.f32 %v922_v1  ;;  %v1838_v6 = vpop.f32.mrb[23].mxu0  ;;  %v1640_v14 = vmul.f32 -1.442695, %v922_v1 }
 0xd55   :  { %v2005_v7 = vpop.eup %2004 }
 0xd56   :  { %932 = vrot.lane.b32.xlu0 %v2005_v7, %s2127_s4 }
 0xd5a   :  { %v994_v8 = vpop.f32.mrb[24].mxu0 }
 0xd5b   :  { %v995_v9 = vadd.f32 %v2337_v34, %v994_v8  ;;  %v1849_v10 = vpop.f32.mrb[25].mxu0 }
 0xd5c   :  { %v997_v11 = vpop.f32.mrb[26].mxu0 }
 0xd5d   :  { %2006 = vtanh.f32 %v995_v9  ;;  %v1850_v12 = vpop.f32.mrb[27].mxu0  ;;  %v1642_v17 = vmul.f32 -1.442695, %v995_v9 }
 0xd5e   :  { %2008 = vpow2.f32 %v1640_v14 }
 0xd67   :  { %v2007_v13 = vpop.eup %2006 }
 0xd68   :  { %1009 = vrot.lane.b32.xlu1 %v2007_v13, %s2127_s4  ;;  %v2009_v0 = vpop.eup %2008 }
 0xd69   :  { %v926_v16 = vadd.f32 1.0, %v2009_v0 }
 0xd6b   :  { %2010 = vrcp.f32 %v926_v16 }
 0xd6c   :  { %2012 = vpow2.f32 %v1642_v17 }
 0xd75   :  { %v2011_v18 = vpop.eup %2010 }
 0xd76   :  { %v2013_v20 = vpop.eup %2012  ;;  %v930_v58 = vmul.f32 %v2011_v18, %v2421_v44 }
 0xd77   :  { %v1003_v25 = vadd.f32 1.0, %v2013_v20 }
 0xd79   :  { %2014 = vrcp.f32 %v1003_v25 }
 0xd83   :  { %v2015_v27 = vpop.eup %2014 }
 0xd84   :  { %v1007_v33 = vmul.f32 %v2015_v27, %v2426_v48 }
 0xdc8   :  { %v933_v19 = vpop.permute.xlu0 %932 }
 0xdc9   :  { %v935_v21 = vmul.f32 %v2011_v18, %v933_v19 }
 0xdcb   :  { %937 = vrot.lane.b32.xlu0 %v935_v21, %s2128_s13 }
 0xdda   :  { %v1010_v28 = vpop.permute.xlu1 %1009 }
 0xddb   :  { %v1012_v29 = vmul.f32 %v2015_v27, %v1010_v28 }
 0xddd   :  { %1014 = vrot.lane.b32.xlu1 %v1012_v29, %s2128_s13 }
 0xe3d   :  { %v938_v30 = vpop.permute.xlu0 %937 }
 0xe3e   :  { %v2459_v31 = vadd.f32 %v938_v30, %v930_v58 }
 0xe40   :  { %2016 = vtanh.f32 %v2459_v31 }
 0xe4a   :  { %v2017_v32 = vpop.eup %2016 }
 0xe4b   :  { %943 = vrot.lane.b32.xlu0 %v2017_v32, %s2127_s4 }
 0xe4f   :  { %v1015_v35 = vpop.permute.xlu1 %1014 }
 0xe50   :  { %v2464_v36 = vadd.f32 %v1015_v35, %v1007_v33 }
 0xe52   :  { %2018 = vtanh.f32 %v2464_v36 }
 0xe5c   :  { %v2019_v37 = vpop.eup %2018 }
 0xe5d   :  { %1020 = vrot.lane.b32.xlu1 %v2019_v37, %s2127_s4 }
 0xebd   :  { %v944_v38 = vpop.permute.xlu0 %943 }
 0xebe   :  { %v946_v41 = vmul.f32 %v2011_v18, %v944_v38 }
 0xec0   :  { %v1024_v55 = vpack.c.bf16 %v946_v41, %v946_v41  ;;  %1097 = vrot.lane.b32.xlu1 %v946_v41, %s2128_s13 }
 0xec2   :  { %1026 = vrot.lane.b32.xlu0 %v1024_v55, %s2128_s13 }
 0xecf   :  { %v1021_v42 = vpop.permute.xlu1 %1020 }
 0xed0   :  { %v1023_v43 = vmul.f32 %v2015_v27, %v1021_v42 }
 0xed2   :  { %1101 = vrot.lane.b32.xlu0 %v1023_v43, %s2127_s4 }
 0xf32   :  { %v1098_v45 = vpop.permute.xlu1 %1097 }
 0xf34   :  { %v1027_v44 = vpop.permute.xlu0 %1026 }
 0xf35   :  { %1856 = vmatmul.mubr.msk.bf16.vlgmr.msra.gmra.mrb[24].mxu1 %vm230_vm11, %v1027_v44 }
 0xf36   :  { %1860 = vmatpush3.bf16.msra.mxu1 %v2291_v22  ;;  %1867 = vmatprep.mubr.msk.bf16.mxu1 %vm2126_vm10, %v2125_v15 }
 0xf37   :  { %1861 = vmatprep.subr.bf16.mxu1 %v2125_v15 }
 0xf3a   :  { %1862 = vmatpush3.bf16.msra.mxu1 %v2297_v23 }
 0xf3b   :  { %1863 = vmatprep.subr.bf16.mxu1 %v2125_v15 }
 0xf3e   :  { %1864 = vmatpush3.bf16.msra.mxu1 %v2304_v24 }
 0xf3f   :  { %1865 = vmatprep.subr.bf16.mxu1 %v2125_v15 }
 0xf42   :  { %1866 = vmatpush3.bf16.msra.mxu1 %v2313_v26 }
 0xf43   :  { %1891 = vmatprep.subr.bf16.mxu1 %v2125_v15 }
 0xf44   :  { %v1102_v46 = vpop.permute.xlu0 %1101 }
 0xf45   :  { %v1104_v47 = vsel %vm230_vm11, %v1098_v45, %v1102_v46 }
 0xf46   :  { %v1105_v48 = vpack.c.bf16 %v1104_v47, %v1104_v47 }
 0xf48   :  { %1868 = vmatmul.mubr.msk.bf16.vlgmr.msra.gmra.mrb[28].mxu1 %vm509_vm12, %v1105_v48 }
 0xf49   :  { %1892 = vmatpush3.bf16.msra.mxu1 %v2240_v39  ;;  %1895 = vmatprep.mubr.msk.bf16.mxu1 %vm2126_vm10, %v2125_v15 }
 0xf4a   :  { %1893 = vmatprep.subr.bf16.mxu1 %v2125_v15 }
 0xf4d   :  { %1894 = vmatpush3.bf16.msra.mxu1 %v2247_v40 }
 0xf4e   :  { %1899 = vmatprep.subr.bf16.mxu1 %v2125_v15 }
0x1008   :  { %v1065_v49 = vpop.f32.mrb[24].mxu1 }
0x1009   :  { %v1071_v50 = vadd.f32 %v1065_v49, %v2281_v4  ;;  %v1857_v51 = vpop.f32.mrb[25].mxu1 }
0x100a   :  { %v1068_v52 = vpop.f32.mrb[26].mxu1 }
0x100b   :  { %2020 = vtanh.f32 %v1071_v50  ;;  %v1858_v53 = vpop.f32.mrb[27].mxu1  ;;  %v1644_v61 = vmul.f32 -1.442695, %v1071_v50 }
0x1015   :  { %v2021_v54 = vpop.eup %2020 }
0x1016   :  { %1081 = vrot.lane.b32.xlu1 %v2021_v54, %s2127_s4 }
0x101b   :  { %v1143_v39 = vpop.f32.mrb[28].mxu1 }
0x101c   :  { %v1144_v56 = vadd.f32 %v2337_v34, %v1143_v39  ;;  %v1869_v57 = vpop.f32.mrb[29].mxu1 }
0x101d   :  { %v1146_v59 = vpop.f32.mrb[30].mxu1 }
0x101e   :  { %2022 = vtanh.f32 %v1144_v56  ;;  %v1870_v60 = vpop.f32.mrb[31].mxu1  ;;  %v1646_v1 = vmul.f32 -1.442695, %v1144_v56 }
0x101f   :  { %2024 = vpow2.f32 %v1644_v61 }
0x1028   :  { %v2023_v40 = vpop.eup %2022 }
0x1029   :  { %1158 = vrot.lane.b32.xlu0 %v2023_v40, %s2127_s4  ;;  %v2025_v4 = vpop.eup %2024 }
0x102a   :  { %v1075_v63 = vadd.f32 1.0, %v2025_v4 }
0x102c   :  { %2026 = vrcp.f32 %v1075_v63 }
0x102d   :  { %2028 = vpow2.f32 %v1646_v1 }
0x1036   :  { %v2027_v3 = vpop.eup %2026 }
0x1037   :  { %v2029_v7 = vpop.eup %2028  ;;  %v1079_v12 = vmul.f32 %v2027_v3, %v2459_v31 }
0x1038   :  { %v1152_v8 = vadd.f32 1.0, %v2029_v7 }
0x103a   :  { %2030 = vrcp.f32 %v1152_v8 }
0x1044   :  { %v2031_v9 = vpop.eup %2030 }
0x1045   :  { %v1156_v16 = vmul.f32 %v2031_v9, %v2464_v36 }
0x1088   :  { %v1082_v5 = vpop.permute.xlu1 %1081 }
0x1089   :  { %v1084_v6 = vmul.f32 %v2027_v3, %v1082_v5 }
0x108b   :  { %1086 = vrot.lane.b32.xlu1 %v1084_v6, %s2128_s13 }
0x109b   :  { %v1159_v10 = vpop.permute.xlu0 %1158 }
0x109c   :  { %v1161_v11 = vmul.f32 %v2031_v9, %v1159_v10 }
0x109e   :  { %1163 = vrot.lane.b32.xlu0 %v1161_v11, %s2128_s13 }
0x10fd   :  { %v1087_v13 = vpop.permute.xlu1 %1086 }
0x10fe   :  { %v2497_v14 = vadd.f32 %v1087_v13, %v1079_v12 }
0x1100   :  { %2032 = vtanh.f32 %v2497_v14 }
0x110a   :  { %v2033_v0 = vpop.eup %2032 }
0x110b   :  { %1092 = vrot.lane.b32.xlu1 %v2033_v0, %s2127_s4 }
0x1110   :  { %v1164_v17 = vpop.permute.xlu0 %1163 }
0x1111   :  { %v2502_v18 = vadd.f32 %v1164_v17, %v1156_v16 }
0x1113   :  { %2034 = vtanh.f32 %v2502_v18 }
0x111d   :  { %v2035_v19 = vpop.eup %2034 }
0x111e   :  { %1169 = vrot.lane.b32.xlu0 %v2035_v19, %s2127_s4 }
0x117d   :  { %v1093_v20 = vpop.permute.xlu1 %1092 }
0x117e   :  { %v1095_v21 = vmul.f32 %v2027_v3, %v1093_v20 }
0x1180   :  { %v1173_v25 = vpack.c.bf16 %v1095_v21, %v1095_v21  ;;  %1246 = vrot.lane.b32.xlu0 %v1095_v21, %s2128_s13 }
0x1182   :  { %1175 = vrot.lane.b32.xlu1 %v1173_v25, %s2128_s13 }
0x1190   :  { %v1170_v27 = vpop.permute.xlu0 %1169 }
0x1191   :  { %v1172_v28 = vmul.f32 %v2031_v9, %v1170_v27 }
0x1193   :  { %1250 = vrot.lane.b32.xlu1 %v1172_v28, %s2127_s4 }
0x11f2   :  { %v1247_v58 = vpop.permute.xlu0 %1246 }
0x11f4   :  { %v1176_v29 = vpop.permute.xlu1 %1175 }
0x11f5   :  { %1876 = vmatmul.mubr.msk.bf16.vlgmr.msra.gmra.mrb[28].mxu0 %vm230_vm11, %v1176_v29 }
0x11f6   :  { %1880 = vmatpush3.bf16.msra.mxu0 %v2291_v22  ;;  %1887 = vmatprep.mubr.msk.bf16.mxu0 %vm2126_vm10, %v2125_v15 }
0x11f7   :  { %1881 = vmatprep.subr.bf16.mxu0 %v2125_v15 }
0x11fa   :  { %1882 = vmatpush3.bf16.msra.mxu0 %v2297_v23 }
0x11fb   :  { %1883 = vmatprep.subr.bf16.mxu0 %v2125_v15 }
0x11fe   :  { %1884 = vmatpush3.bf16.msra.mxu0 %v2304_v24 }
0x11ff   :  { %1885 = vmatprep.subr.bf16.mxu0 %v2125_v15 }
0x1202   :  { %1886 = vmatpush3.bf16.msra.mxu0 %v2313_v26 }
0x1203   :  { %1911 = vmatprep.subr.bf16.mxu0 %v2125_v15 }
0x1205   :  { %v1251_v30 = vpop.permute.xlu1 %1250 }
0x1206   :  { %v1253_v31 = vsel %vm230_vm11, %v1247_v58, %v1251_v30 }
0x1207   :  { %v1254_v32 = vpack.c.bf16 %v1253_v31, %v1253_v31 }
0x1209   :  { %1888 = vmatmul.mubr.msk.bf16.vlgmr.msra.gmra.mrb[32].mxu0 %vm509_vm12, %v1254_v32 }
0x120a   :  { %1912 = vmatpush3.bf16.msra.mxu0 %v2291_v22  ;;  %1919 = vmatprep.mubr.msk.bf16.mxu0 %vm2126_vm10, %v2125_v15 }
0x120b   :  { %1913 = vmatprep.subr.bf16.mxu0 %v2125_v15 }
0x120e   :  { %1914 = vmatpush3.bf16.msra.mxu0 %v2297_v23 }
0x120f   :  { %1915 = vmatprep.subr.bf16.mxu0 %v2125_v15 }
0x1212   :  { %1916 = vmatpush3.bf16.msra.mxu0 %v2304_v24 }
0x1213   :  { %1917 = vmatprep.subr.bf16.mxu0 %v2125_v15 }
0x1216   :  { %1918 = vmatpush3.bf16.msra.mxu0 %v2313_v26 }
0x12c8   :  { %v1214_v33 = vpop.f32.mrb[28].mxu0 }
0x12c9   :  { %v1220_v35 = vadd.f32 %v1214_v33, %v2275_v62  ;;  %v1877_v36 = vpop.f32.mrb[29].mxu0 }
0x12ca   :  { %v1217_v37 = vpop.f32.mrb[30].mxu0 }
0x12cb   :  { %2036 = vtanh.f32 %v1220_v35  ;;  %v1878_v38 = vpop.f32.mrb[31].mxu0  ;;  %v1648_v47 = vmul.f32 -1.442695, %v1220_v35 }
0x12d5   :  { %v2037_v41 = vpop.eup %2036 }
0x12d6   :  { %1230 = vrot.lane.b32.xlu0 %v2037_v41, %s2127_s4 }
0x12dc   :  { %v1292_v55 = vpop.f32.mrb[32].mxu0 }
0x12dd   :  { %v1293_v42 = vadd.f32 %v2337_v34, %v1292_v55  ;;  %v1889_v43 = vpop.f32.mrb[33].mxu0 }
0x12de   :  { %v1295_v44 = vpop.f32.mrb[34].mxu0 }
0x12df   :  { %2038 = vtanh.f32 %v1293_v42  ;;  %v1890_v45 = vpop.f32.mrb[35].mxu0  ;;  %v1650_v49 = vmul.f32 -1.442695, %v1293_v42 }
0x12e0   :  { %2040 = vpow2.f32 %v1648_v47 }
0x12e9   :  { %v2039_v46 = vpop.eup %2038 }
0x12ea   :  { %1307 = vrot.lane.b32.xlu1 %v2039_v46, %s2127_s4  ;;  %v2041_v62 = vpop.eup %2040 }
0x12eb   :  { %v1224_v48 = vadd.f32 1.0, %v2041_v62 }
0x12ed   :  { %2042 = vrcp.f32 %v1224_v48 }
0x12ee   :  { %2044 = vpow2.f32 %v1650_v49 }
0x12f7   :  { %v2043_v50 = vpop.eup %2042 }
0x12f8   :  { %v2045_v53 = vpop.eup %2044  ;;  %v1228_v59 = vmul.f32 %v2043_v50, %v2497_v14 }
0x12f9   :  { %v1301_v54 = vadd.f32 1.0, %v2045_v53 }
0x12fb   :  { %2046 = vrcp.f32 %v1301_v54 }
0x1305   :  { %v2047_v39 = vpop.eup %2046 }
0x1306   :  { %v1305_v4 = vmul.f32 %v2047_v39, %v2502_v18 }
0x1348   :  { %v1231_v51 = vpop.permute.xlu0 %1230 }
0x1349   :  { %v1233_v52 = vmul.f32 %v2043_v50, %v1231_v51 }
0x134b   :  { %1235 = vrot.lane.b32.xlu0 %v1233_v52, %s2128_s13 }
0x135c   :  { %v1308_v56 = vpop.permute.xlu1 %1307 }
0x135d   :  { %v1310_v57 = vmul.f32 %v2047_v39, %v1308_v56 }
0x135f   :  { %1312 = vrot.lane.b32.xlu1 %v1310_v57, %s2128_s13 }
0x13bd   :  { %v1236_v60 = vpop.permute.xlu0 %1235 }
0x13be   :  { %v2538_v40 = vadd.f32 %v1236_v60, %v1228_v59 }
0x13c0   :  { %2048 = vtanh.f32 %v2538_v40 }
0x13ca   :  { %v2049_v61 = vpop.eup %2048 }
0x13cb   :  { %1241 = vrot.lane.b32.xlu0 %v2049_v61, %s2127_s4 }
0x13d1   :  { %v1313_v63 = vpop.permute.xlu1 %1312 }
0x13d2   :  { %v2543_v1 = vadd.f32 %v1313_v63, %v1305_v4 }
0x13d4   :  { %2050 = vtanh.f32 %v2543_v1 }
0x13de   :  { %v2051_v3 = vpop.eup %2050 }
0x13df   :  { %1318 = vrot.lane.b32.xlu1 %v2051_v3, %s2127_s4 }
0x143d   :  { %v1242_v5 = vpop.permute.xlu0 %1241 }
0x143e   :  { %v1244_v6 = vmul.f32 %v2043_v50, %v1242_v5 }
0x1440   :  { %v1322_v7 = vpack.c.bf16 %v1244_v6, %v1244_v6  ;;  %1395 = vrot.lane.b32.xlu1 %v1244_v6, %s2128_s13 }
0x1442   :  { %1324 = vrot.lane.b32.xlu0 %v1322_v7, %s2128_s13 }
0x1451   :  { %v1319_v8 = vpop.permute.xlu1 %1318 }
0x1452   :  { %v1321_v9 = vmul.f32 %v2047_v39, %v1319_v8 }
0x1454   :  { %1399 = vrot.lane.b32.xlu0 %v1321_v9, %s2127_s4 }
0x14b2   :  { %v1396_v11 = vpop.permute.xlu1 %1395 }
0x14b4   :  { %v1325_v10 = vpop.permute.xlu0 %1324 }
0x14b5   :  { %1896 = vmatmul.mubr.msk.bf16.vlgmr.msra.gmra.mrb[32].mxu1 %vm230_vm11, %v1325_v10 }
0x14b6   :  { %1900 = vmatpush3.bf16.msra.mxu1 %v2291_v22  ;;  %1907 = vmatprep.mubr.msk.bf16.mxu1 %vm2126_vm10, %v2125_v15 }
0x14b7   :  { %1901 = vmatprep.subr.bf16.mxu1 %v2125_v15 }
0x14ba   :  { %1902 = vmatpush3.bf16.msra.mxu1 %v2297_v23 }
0x14bb   :  { %1903 = vmatprep.subr.bf16.mxu1 %v2125_v15 }
0x14be   :  { %1904 = vmatpush3.bf16.msra.mxu1 %v2304_v24 }
0x14bf   :  { %1905 = vmatprep.subr.bf16.mxu1 %v2125_v15 }
0x14c2   :  { %1906 = vmatpush3.bf16.msra.mxu1 %v2313_v26 }
0x14c6   :  { %v1400_v12 = vpop.permute.xlu0 %1399 }
0x14c7   :  { %v1402_v13 = vsel %vm230_vm11, %v1396_v11, %v1400_v12 }
0x14c8   :  { %v1403_v22 = vpack.c.bf16 %v1402_v13, %v1402_v13 }
0x14ca   :  { %1908 = vmatmul.mubr.msk.bf16.vlgmr.msra.gmra.mrb[36].mxu1 %vm509_vm12, %v1403_v22 }
0x1588   :  { %v1363_v14 = vpop.f32.mrb[32].mxu1 }
0x1589   :  { %v1369_v0 = vadd.f32 %v1363_v14, %v2279_v2  ;;  %v1897_v16 = vpop.f32.mrb[33].mxu1 }
0x158a   :  { %v1366_v23 = vpop.f32.mrb[34].mxu1 }
0x158b   :  { %2052 = vtanh.f32 %v1369_v0  ;;  %v1898_v17 = vpop.f32.mrb[35].mxu1  ;;  %v1652_v25 = vmul.f32 -1.442695, %v1369_v0 }
0x1595   :  { %v2053_v18 = vpop.eup %2052 }
0x1596   :  { %1379 = vrot.lane.b32.xlu1 %v2053_v18, %s2127_s4 }
0x159d   :  { %v1441_v15 = vpop.f32.mrb[36].mxu1 }
0x159e   :  { %v1442_v24 = vadd.f32 %v2337_v34, %v1441_v15  ;;  %v1909_v26 = vpop.f32.mrb[37].mxu1 }
0x159f   :  { %v1444_v19 = vpop.f32.mrb[38].mxu1 }
0x15a0   :  { %2054 = vtanh.f32 %v1442_v24  ;;  %v1910_v20 = vpop.f32.mrb[39].mxu1  ;;  %v1654_v28 = vmul.f32 -1.442695, %v1442_v24 }
0x15a1   :  { %2056 = vpow2.f32 %v1652_v25 }
0x15aa   :  { %v2055_v21 = vpop.eup %2054 }
0x15ab   :  { %1456 = vrot.lane.b32.xlu0 %v2055_v21, %s2127_s4  ;;  %v2057_v2 = vpop.eup %2056 }
0x15ac   :  { %v1373_v27 = vadd.f32 1.0, %v2057_v2 }
0x15ae   :  { %2058 = vrcp.f32 %v1373_v27 }
0x15af   :  { %2060 = vpow2.f32 %v1654_v28 }
0x15b8   :  { %v2059_v29 = vpop.eup %2058 }
0x15b9   :  { %v2061_v31 = vpop.eup %2060  ;;  %v1377_v37 = vmul.f32 %v2059_v29, %v2538_v40 }
0x15ba   :  { %v1450_v32 = vadd.f32 1.0, %v2061_v31 }
0x15bc   :  { %2062 = vrcp.f32 %v1450_v32 }
0x15c6   :  { %v2063_v33 = vpop.eup %2062 }
0x15c7   :  { %v1454_v42 = vmul.f32 %v2063_v33, %v2543_v1 }
0x1608   :  { %v1380_v58 = vpop.permute.xlu1 %1379 }
0x1609   :  { %v1382_v30 = vmul.f32 %v2059_v29, %v1380_v58 }
0x160b   :  { %1384 = vrot.lane.b32.xlu1 %v1382_v30, %s2128_s13 }
0x161d   :  { %v1457_v35 = vpop.permute.xlu0 %1456 }
0x161e   :  { %v1459_v36 = vmul.f32 %v2063_v33, %v1457_v35 }
0x1620   :  { %1461 = vrot.lane.b32.xlu0 %v1459_v36, %s2128_s13 }
0x167d   :  { %v1385_v38 = vpop.permute.xlu1 %1384 }
0x167e   :  { %v1387_v41 = vadd.f32 %v1385_v38, %v1377_v37 }
0x1680   :  { %2064 = vtanh.f32 %v1387_v41 }
0x168a   :  { %v2065_v55 = vpop.eup %2064 }
0x168b   :  { %1390 = vrot.lane.b32.xlu1 %v2065_v55, %s2127_s4 }
0x1692   :  { %v1462_v43 = vpop.permute.xlu0 %1461 }
0x1693   :  { %v1464_v44 = vadd.f32 %v1462_v43, %v1454_v42 }
0x1695   :  { %2066 = vtanh.f32 %v1464_v44 }
0x169f   :  { %v2067_v45 = vpop.eup %2066 }
0x16a0   :  { %1467 = vrot.lane.b32.xlu0 %v2067_v45, %s2127_s4 }
0x16fd   :  { %v1391_v46 = vpop.permute.xlu1 %1390 }
0x16fe   :  { %v1393_v47 = vmul.f32 %v2059_v29, %v1391_v46 }
0x1700   :  { %1472 = vrot.lane.b32.xlu1 %v1393_v47, %s2128_s13 }
0x1712   :  { %v1468_v62 = vpop.permute.xlu0 %1467 }
0x1713   :  { %v1470_v48 = vmul.f32 %v2063_v33, %v1468_v62 }
0x1715   :  { %1476 = vrot.lane.b32.xlu0 %v1470_v48, %s2127_s4 }
0x1772   :  { %v1473_v49 = vpop.permute.xlu1 %1472 }
0x1773   :  { %1552 = vst.msk [vmem:[#allocation2] sm:$0xff] %vm230_vm11, %v1473_v49 }
0x1787   :  { %v1477_v50 = vpop.permute.xlu0 %1476 }
0x1788   :  { %v1479_v51 = vsel %vm230_vm11, %v1473_v49, %v1477_v50 }
0x1789   :  { %v1480_v52 = vpack.c.bf16 %v1479_v51, %v1479_v51 }
0x178b   :  { %1920 = vmatmul.mubr.msk.bf16.vlgmr.msra.gmra.mrb[36].mxu0 %vm509_vm12, %v1480_v52 }
0x185e   :  { %v1518_v53 = vpop.f32.mrb[36].mxu0 }
0x185f   :  { %v1519_v54 = vadd.f32 %v2337_v34, %v1518_v53  ;;  %v1921_v39 = vpop.f32.mrb[37].mxu0 }
0x1860   :  { %v1521_v56 = vpop.f32.mrb[38].mxu0 }
0x1861   :  { %2068 = vtanh.f32 %v1519_v54  ;;  %v1922_v57 = vpop.f32.mrb[39].mxu0  ;;  %v1656_v60 = vmul.f32 -1.442695, %v1519_v54 }
0x1863   :  { %2070 = vpow2.f32 %v1656_v60 }
0x186b   :  { %v2069_v59 = vpop.eup %2068 }
0x186c   :  { %1533 = vrot.lane.b32.xlu1 %v2069_v59, %s2127_s4 }
0x186d   :  { %v2071_v40 = vpop.eup %2070 }
0x186e   :  { %v1527_v61 = vadd.f32 1.0, %v2071_v40 }
0x1870   :  { %2072 = vrcp.f32 %v1527_v61 }
0x187a   :  { %v2073_v4 = vpop.eup %2072 }
0x187b   :  { %v1531_v3 = vmul.f32 %v2073_v4, %v1464_v44 }
0x18de   :  { %v1534_v63 = vpop.permute.xlu1 %1533 }
0x18df   :  { %v1536_v1 = vmul.f32 %v2073_v4, %v1534_v63 }
0x18e1   :  { %1538 = vrot.lane.b32.xlu0 %v1536_v1, %s2128_s13 }
0x1953   :  { %v1539_v5 = vpop.permute.xlu0 %1538 }
0x1954   :  { %v1541_v34 = vadd.f32 %v1539_v5, %v1531_v3 }
0x1956   :  { %2074 = vtanh.f32 %v1541_v34 }
0x1960   :  { %v2075_v6 = vpop.eup %2074 }
0x1961   :  { %1544 = vrot.lane.b32.xlu1 %v2075_v6, %s2127_s4 }
0x1965   :  { %1556 = vrot.lane.b32.xlu1 %v1387_v41, %s2129_s6 }
0x19d3   :  { %v1545_v7 = vpop.permute.xlu1 %1544 }
0x19d4   :  { %v1547_v8 = vmul.f32 %v2073_v4, %v1545_v7 }
0x19d6   :  { %1549 = vrot.lane.b32.xlu0 %v1547_v8, %s2128_s13 }
0x19d7   :  { %v1557_v9 = vpop.permute.xlu1 %1556 }
0x19d8   :  { %1562 = vst.msk [vmem:[#allocation4] sm:$0xff] %vm230_vm11, %v1557_v9 }
0x19da   :  { %1558 = vrot.lane.b32.xlu0 %v1541_v34, %s2129_s6 }
0x1a48   :  { %v1550_v10 = vpop.permute.xlu0 %1549 }
0x1a49   :  { %1553 = vst.msk [vmem:[#allocation2 + $0x8] sm:$0xff] %vm230_vm11, %v1550_v10 }
0x1a4a   :  { %2087 = shalt.err (!%p2084_p4)
}
0x1a4b   :  { %s2088_s30 = scalar_lea.hbm %s2616_s7, 256 }
0x1a4c   :  { %p2089_p5 = scmp.ne.s32.totalorder %s2616_s7, %s2088_s30  ;;  %p2092_p6 = scmp.lt.u32.totalorder %s2088_s30, %s2616_s7 }
0x1a4e   :  { %p2094_p7 = pnand %p2092_p6, %p2089_p5 }
0x1a50   :  { %2097 = shalt.err (!%p2094_p7)
}
0x1a51   :  { %s2132_s11 = smov 128   ;;  %s2133_s12 = smov 8   ;;  %v1559_v11 = vpop.permute.xlu0 %1558 }
0x1a52   :  { %1575 = dma.vmem_to_hbm [thread:$0]  %s1570_s24, 256, %s2616_s7, [#allocation3], %s2132_s11, %s2132_s11, %s2133_s12   ;;  %1563 = vst.msk [vmem:[#allocation4 + $0x8] sm:$0xff] %vm230_vm11, %v1559_v11 }
0x1a53   :  { %s2098_s4 = scalar_lea.vmem %s1582_s26, 256  ;;  %p2103_p9 = scmp.lt.s32.totalorder %s1582_s26, %s1582_s26 }
0x1a54   :  { %p2099_p8 = scmp.ne.s32.totalorder %s1582_s26, %s2098_s4  ;;  %p2104_p10 = scmp.lt.s32.totalorder %s2098_s4, %s2098_s4 }
0x1a56   :  { %p2105_p11 = por %p2104_p10, %p2103_p9 }
0x1a58   :  { %p2106_p12 = pnand %p2105_p11, %p2099_p8 }
0x1a5a   :  { %2109 = shalt.err (!%p2106_p12)
}
0x1a5b   :  { %s2110_s15 = scalar_lea.hbm %s2617_s8, 256 }
0x1a5c   :  { %p2111_p13 = scmp.ne.s32.totalorder %s2617_s8, %s2110_s15  ;;  %p2114_p0 = scmp.lt.u32.totalorder %s2110_s15, %s2617_s8 }
0x1a5e   :  { %p2116_p1 = pnand %p2114_p0, %p2111_p13 }
0x1a60   :  { %2119 = shalt.err (!%p2116_p1)
}
0x1a61   :  { %1587 = dma.vmem_to_hbm [thread:$0]  %s1582_s26, 256, %s2617_s8, [#allocation5], %s2132_s11, %s2132_s11, %s2133_s12  }
0x1a62   :  { %2120 = dma.done.wait [#allocation3], 256  }
0x1a63   :  { %2121 = vsyncadd [#allocation3], 4294967040 }
0x1a64   :  { %2122 = dma.done.wait [#allocation5], 256  }
0x1a65   :  { %2123 = vsyncadd [#allocation5], 4294967040 }
0x1a66   :  { %1594 = vsyncpa [#allocation3], 1 }
0x1a67   :  { %1595 = vsyncpa [#allocation5], 1 }

</bundles_post_ra>
